<compile_context>
chip_gen: v5e
topology: v5e:2x2
jax: 0.10.0
libtpu: 0.0.40
codegen_flags: <defaults>
</compile_context>

<pallas_src>
import numpy as np
import jax
import jax.numpy as jnp
from jax.experimental import pallas as pl
from jax.experimental.pallas import tpu as pltpu

# K (= 9*Cin = 36) is tiny here so f32 HIGHEST costs nothing; at real channel
# counts feed bf16 inputs with preferred_element_type=f32 instead.
_HIGH = jax.lax.Precision.HIGHEST


def _make_panet_kernel(N, Cin, G, H, W):
    """Build the Pallas kernel body for static dims (N, Cin, G, H, W)."""
    HW = H * W

    def dot(a, b):
        return jnp.dot(a, b, preferred_element_type=jnp.float32, precision=_HIGH)

    def rep_rows(mat, reps):
        # (N, C) -> (N*reps, C): row n repeated `reps` times consecutively, so a
        # per-(n, c) scalar scales a whole NHWC-flat slab with ONE multiply.
        C = mat.shape[1]
        return jnp.concatenate(
            [jnp.broadcast_to(mat[n:n + 1, :], (reps, C)) for n in range(N)],
            axis=0)

    def pad1(slab, Hs, Ws):
        # NHWC-flat (N*Hs*Ws, C) -> zero-padded NHWC-flat (N*(Hs+2)*(Ws+2), C).
        C = slab.shape[1]
        Wp = Ws + 2
        zrow = jnp.zeros((1, C), jnp.float32)
        zline = jnp.broadcast_to(zrow, (Wp, C))
        pieces = []
        for n in range(N):
            base = n * Hs * Ws
            pieces.append(zline)                                   # top pad row
            for h in range(Hs):
                pieces.append(zrow)                                # left pad
                pieces.append(slab[base + h * Ws:base + (h + 1) * Ws, :])
                pieces.append(zrow)                                # right pad
            pieces.append(zline)                                   # bottom pad
        return jnp.concatenate(pieces, axis=0), Hs + 2, Ws + 2

    def dilate2_pad(slab, Hs, Ws):
        # Input prep for ConvTranspose2d(k=3, s=2, p=1, output_padding=1):
        # zero-dilate by 2 (plus one trailing zero row/col) and add a 1-ring of
        # zeros -> (N*(2Hs+2)*(2Ws+2), C).  A stride-1 3x3 conv with the flipped
        # kernel over this is exactly the transposed conv.
        C = slab.shape[1]
        Hp, Wp = 2 * Hs + 2, 2 * Ws + 2
        zrow = jnp.zeros((1, C), jnp.float32)
        z2row = jnp.broadcast_to(zrow, (2, C))
        zline = jnp.broadcast_to(zrow, (Wp, C))
        pieces = []
        for n in range(N):
            base = n * Hs * Ws
            pieces.append(zline)                                   # top pad row
            for h in range(Hs):
                pieces.append(zrow)                                # left pad
                for w in range(Ws):
                    pieces.append(slab[base + h * Ws + w:base + h * Ws + w + 1, :])
                    pieces.append(z2row if w == Ws - 1 else zrow)  # dilation 0s
                pieces.append(zline)                               # dilated row
            pieces.append(zline)                                   # bottom pad
        return jnp.concatenate(pieces, axis=0), Hp, Wp

    def conv3x3(slabp, Hp, Wp, w_flat_ref, b_ref, stride):
        # 3x3 conv (padding already baked into slabp) as ONE im2col matmul:
        #   (N*Ho*Wo, 9*Cin) @ (9*Cin, Cout), bias added once (hoisted).
        Ho = (Hp - 3) // stride + 1
        Wo = (Wp - 3) // stride + 1
        taps = []
        for kh in range(3):
            for kw in range(3):
                pieces = []
                for n in range(N):
                    base = n * Hp * Wp
                    for oh in range(Ho):
                        r0 = base + (stride * oh + kh) * Wp + kw
                        if stride == 1:
                            pieces.append(slabp[r0:r0 + Wo, :])    # contiguous
                        else:
                            for ow in range(Wo):
                                r = r0 + stride * ow
                                pieces.append(slabp[r:r + 1, :])
                taps.append(pieces[0] if len(pieces) == 1
                            else jnp.concatenate(pieces, axis=0))
        patches = jnp.concatenate(taps, axis=1)                    # (M, 9*Cin)
        out = dot(patches, w_flat_ref[...]) + b_ref[...]
        return out, Ho, Wo

    def kernel(x_ref, w1_ref, b1_ref, w2_ref, b2_ref, wa_ref, ba_ref,
               wu1_ref, bu1_ref, wu2_ref, bu2_ref, out_ref):
        relu = lambda v: jnp.maximum(v, 0.0)

        # NCHW-flat (N*Cin, H*W) -> NHWC-flat slab (N*H*W, Cin)
        # (per-sample 2-D transpose keeps the channel contraction on lanes).
        x_slab = jnp.concatenate(
            [x_ref[n * Cin:(n + 1) * Cin, :].T for n in range(N)], axis=0)

        # Encoder: two stride-2 3x3 convs (one im2col matmul each).
        xp, Hp, Wp = pad1(x_slab, H, W)
        d1, H1, W1 = conv3x3(xp, Hp, Wp, w1_ref, b1_ref, stride=2)
        d1 = relu(d1)                                              # (N*H1*W1, G)

        d1p, Hp, Wp = pad1(d1, H1, W1)
        d2, H2, W2 = conv3x3(d1p, Hp, Wp, w2_ref, b2_ref, stride=2)
        d2 = relu(d2)                                              # (N*H2*W2, G)

        # The PyTorch module's broadcasting requires a 1x1 attention map and
        # Cin == G (i.e. H = W = 4).
        assert H2 == 1 and W2 == 1 and Cin == G

        # 1x1 attention conv + sigmoid (tanh form: stable, runs on the EUP).
        logits = dot(d2, wa_ref[...]) + ba_ref[...]                # (N, Cin)
        att = 0.5 * (jnp.tanh(0.5 * logits) + 1.0)

        # Decoder: transposed convs as stride-1 convs over dilated inputs.
        d2d, Hp, Wp = dilate2_pad(d2, H2, W2)
        u1, Hu1, Wu1 = conv3x3(d2d, Hp, Wp, wu1_ref, bu1_ref, stride=1)
        u1 = relu(u1)                                              # (N*H1*W1, G)
        assert (Hu1, Wu1) == (H1, W1)

        # mix = up1 + down1 * attention  : one slab multiply-add.
        mix = u1 + d1 * rep_rows(att, H1 * W1)

        mixd, Hp, Wp = dilate2_pad(mix, H1, W1)
        u2, Hu2, Wu2 = conv3x3(mixd, Hp, Wp, wu2_ref, bu2_ref, stride=1)
        u2 = relu(u2)                                              # (N*H*W, Cin)
        assert (Hu2, Wu2) == (H, W)

        # out = x + up2 * attention, assembled to NCHW-flat, single store.
        out_slab = x_slab + u2 * rep_rows(att, HW)                 # (N*H*W, Cin)
        out_ref[...] = jnp.concatenate(
            [out_slab[n * HW:(n + 1) * HW, :].T for n in range(N)], axis=0)

    return kernel


def prepare_params(params):
    """One-time parameter layout prep (hoisted out of the per-call path)."""
    f32 = jnp.float32

    def conv_w(w):    # Conv2d weight (Cout, Cin, 3, 3) -> im2col (9*Cin, Cout)
        Cout, Cin = w.shape[0], w.shape[1]
        return jnp.transpose(w, (2, 3, 1, 0)).reshape(9 * Cin, Cout).astype(f32)

    def convt_w(w):   # ConvTranspose2d (Cin, Cout, 3, 3) -> flipped im2col (9*Cin, Cout)
        Cin, Cout = w.shape[0], w.shape[1]
        return (jnp.transpose(w[:, :, ::-1, ::-1], (2, 3, 0, 1))
                .reshape(9 * Cin, Cout).astype(f32))

    brow = lambda b: b.reshape(1, -1).astype(f32)
    return {
        'w1': conv_w(params['w1']), 'b1': brow(params['b1']),
        'w2': conv_w(params['w2']), 'b2': brow(params['b2']),
        'wa': jnp.transpose(params['wa'][:, :, 0, 0], (1, 0)).astype(f32),  # (G, Cin)
        'ba': brow(params['ba']),
        'wu1': convt_w(params['wu1']), 'bu1': brow(params['bu1']),
        'wu2': convt_w(params['wu2']), 'bu2': brow(params['bu2']),
    }


@jax.jit
def panet_pallas(x_nchw, prepared):
    N, Cin, H, W = x_nchw.shape
    G = prepared['w1'].shape[-1]
    kernel = _make_panet_kernel(N, Cin, G, H, W)

    # NCHW -> (N*C, H*W) is a free contiguous reshape; the kernel handles the
    # matmul-friendly layout internally and stores NCHW-flat directly, so the
    # only per-call XLA ops outside the kernel are bitcast reshapes.
    x2d = x_nchw.astype(jnp.float32).reshape(N * Cin, H * W)

    args = (x2d, prepared['w1'], prepared['b1'], prepared['w2'], prepared['b2'],
            prepared['wa'], prepared['ba'], prepared['wu1'], prepared['bu1'],
            prepared['wu2'], prepared['bu2'])

    # TODO(synk): at real SRMNet feature-map sizes, tile H/W with a grid
    # (dimension_semantics=("parallel", ...) for the 2 TCs on v7x, ~half-size
    # VMEM tiles vs v6e) and feed bf16 to the MXU; at 4x4 a single grid-less
    # invocation is already latency-bound.
    out2d = pl.pallas_call(
        kernel,
        out_shape=jax.ShapeDtypeStruct((N * Cin, H * W), jnp.float32),
        in_specs=[pl.BlockSpec(memory_space=pltpu.MemorySpace.VMEM)] * len(args),
        out_specs=pl.BlockSpec(memory_space=pltpu.MemorySpace.VMEM),
    )(*args)
    return out2d.reshape(N, Cin, H, W)


def panet_ref(x, p):
    """Pure-JAX reference (XLA convs), matching PyTorch semantics."""
    dn = ('NCHW', 'OIHW', 'NCHW')
    relu = lambda v: jnp.maximum(v, 0.0)

    def conv(v, w, bias, stride, pad):
        y = jax.lax.conv_general_dilated(v, w, (stride, stride),
                                         ((pad, pad), (pad, pad)),
                                         dimension_numbers=dn, precision=_HIGH)
        return y + bias[None, :, None, None]

    def convt(v, w, bias):
        # ConvTranspose2d(k=3, s=2, p=1, output_padding=1) == conv of the
        # 2x-dilated input with the flipped, channel-swapped kernel, pad (1,2).
        w_oihw = jnp.transpose(w[:, :, ::-1, ::-1], (1, 0, 2, 3))
        y = jax.lax.conv_general_dilated(v, w_oihw, (1, 1),
                                         ((1, 2), (1, 2)), lhs_dilation=(2, 2),
                                         dimension_numbers=dn, precision=_HIGH)
        return y + bias[None, :, None, None]

    d1 = relu(conv(x, p['w1'], p['b1'], 2, 1))
    d2 = relu(conv(d1, p['w2'], p['b2'], 2, 1))
    att = jax.nn.sigmoid(conv(d2, p['wa'], p['ba'], 1, 0))
    u1 = relu(convt(d2, p['wu1'], p['bu1']))
    u2 = relu(convt(u1 + d1 * att, p['wu2'], p['bu2']))
    return x + u2 * att


if __name__ == "__main__":
    N, Cin, G, H, W = 2, 4, 4, 4, 4
    key = jax.random.PRNGKey(0)
    ks = jax.random.split(key, 11)
    rnd = lambda k, s: 0.2 * jax.random.normal(k, s, jnp.float32)
    params = {
        'w1': rnd(ks[0], (G, Cin, 3, 3)),  'b1': rnd(ks[1], (G,)),
        'w2': rnd(ks[2], (G, G, 3, 3)),    'b2': rnd(ks[3], (G,)),
        'wa': rnd(ks[4], (Cin, G, 1, 1)),  'ba': rnd(ks[5], (Cin,)),
        'wu1': rnd(ks[6], (G, G, 3, 3)),   'bu1': rnd(ks[7], (G,)),
        'wu2': rnd(ks[8], (G, Cin, 3, 3)), 'bu2': rnd(ks[9], (Cin,)),
    }
    x = jax.random.normal(ks[10], (N, Cin, H, W), jnp.float32)

    prepared = prepare_params(params)      # one-time layout prep (hoisted)
    out = jax.block_until_ready(panet_pallas(x, prepared))
    ref = jax.block_until_ready(panet_ref(x, params))
    np.testing.assert_allclose(np.asarray(out), np.asarray(ref),
                               rtol=5e-3, atol=5e-3)
    print("KERNEL_OK")
</pallas_src>

<mosaic_0001>
module attributes {stable_mosaic.version = 11 : i64} {
  func.func @kernel(%arg0: memref<8x16xf32, #tpu.memory_space<vmem>>, %arg1: memref<36x4xf32, #tpu.memory_space<vmem>>, %arg2: memref<1x4xf32, #tpu.memory_space<vmem>>, %arg3: memref<36x4xf32, #tpu.memory_space<vmem>>, %arg4: memref<1x4xf32, #tpu.memory_space<vmem>>, %arg5: memref<4x4xf32, #tpu.memory_space<vmem>>, %arg6: memref<1x4xf32, #tpu.memory_space<vmem>>, %arg7: memref<36x4xf32, #tpu.memory_space<vmem>>, %arg8: memref<1x4xf32, #tpu.memory_space<vmem>>, %arg9: memref<36x4xf32, #tpu.memory_space<vmem>>, %arg10: memref<1x4xf32, #tpu.memory_space<vmem>>, %arg11: memref<8x16xf32, #tpu.memory_space<vmem>>) attributes {dimension_semantics = [], scalar_prefetch = 0 : i64, scratch_operands = 0 : i64, tpu.core_type = #tpu.core_type<tc>} {
    %c0 = arith.constant 0 : index
    %c0_0 = arith.constant 0 : index
    %0 = vector.load %arg0[%c0, %c0_0] : memref<8x16xf32, #tpu.memory_space<vmem>>, vector<4x16xf32>
    %1 = tpu.transpose %0, [1, 0] : vector<4x16xf32> -> vector<16x4xf32>
    %c4 = arith.constant 4 : index
    %c0_1 = arith.constant 0 : index
    %2 = vector.load %arg0[%c4, %c0_1] : memref<8x16xf32, #tpu.memory_space<vmem>>, vector<4x16xf32>
    %3 = tpu.transpose %2, [1, 0] : vector<4x16xf32> -> vector<16x4xf32>
    %4 = tpu.concatenate %1, %3 in 0 : vector<16x4xf32>, vector<16x4xf32> -> vector<32x4xf32>
    %cst = arith.constant 0.000000e+00 : f32
    %5 = vector.broadcast %cst : f32 to vector<1x4xf32>
    %6 = vector.shape_cast %5 : vector<1x4xf32> to vector<1x4xf32>
    %7 = vector.broadcast %6 : vector<1x4xf32> to vector<6x4xf32>
    %8 = vector.extract_strided_slice %4 {offsets = [0, 0], sizes = [4, 4], strides = [1, 1]} : vector<32x4xf32> to vector<4x4xf32>
    %9 = vector.extract_strided_slice %4 {offsets = [4, 0], sizes = [4, 4], strides = [1, 1]} : vector<32x4xf32> to vector<4x4xf32>
    %10 = vector.extract_strided_slice %4 {offsets = [8, 0], sizes = [4, 4], strides = [1, 1]} : vector<32x4xf32> to vector<4x4xf32>
    %11 = vector.extract_strided_slice %4 {offsets = [12, 0], sizes = [4, 4], strides = [1, 1]} : vector<32x4xf32> to vector<4x4xf32>
    %12 = vector.extract_strided_slice %4 {offsets = [16, 0], sizes = [4, 4], strides = [1, 1]} : vector<32x4xf32> to vector<4x4xf32>
    %13 = vector.extract_strided_slice %4 {offsets = [20, 0], sizes = [4, 4], strides = [1, 1]} : vector<32x4xf32> to vector<4x4xf32>
    %14 = vector.extract_strided_slice %4 {offsets = [24, 0], sizes = [4, 4], strides = [1, 1]} : vector<32x4xf32> to vector<4x4xf32>
    %15 = vector.extract_strided_slice %4 {offsets = [28, 0], sizes = [4, 4], strides = [1, 1]} : vector<32x4xf32> to vector<4x4xf32>
    %16 = tpu.concatenate %7, %5, %8, %5, %5, %9, %5, %5, %10, %5, %5, %11, %5, %7, %7, %5 in 0 : vector<6x4xf32>, vector<1x4xf32>, vector<4x4xf32>, vector<1x4xf32>, vector<1x4xf32>, vector<4x4xf32>, vector<1x4xf32>, vector<1x4xf32>, vector<4x4xf32>, vector<1x4xf32>, vector<1x4xf32>, vector<4x4xf32>, vector<1x4xf32>, vector<6x4xf32>, vector<6x4xf32>, vector<1x4xf32> -> vector<43x4xf32>
    %17 = tpu.concatenate %12, %5, %5, %13, %5, %5, %14, %5, %5, %15, %5, %7 in 0 : vector<4x4xf32>, vector<1x4xf32>, vector<1x4xf32>, vector<4x4xf32>, vector<1x4xf32>, vector<1x4xf32>, vector<4x4xf32>, vector<1x4xf32>, vector<1x4xf32>, vector<4x4xf32>, vector<1x4xf32>, vector<6x4xf32> -> vector<29x4xf32>
    %18 = tpu.concatenate %16, %17 in 0 : vector<43x4xf32>, vector<29x4xf32> -> vector<72x4xf32>
    %19 = vector.extract_strided_slice %18 {offsets = [0, 0], sizes = [1, 4], strides = [1, 1]} : vector<72x4xf32> to vector<1x4xf32>
    %20 = vector.extract_strided_slice %18 {offsets = [2, 0], sizes = [1, 4], strides = [1, 1]} : vector<72x4xf32> to vector<1x4xf32>
    %21 = vector.extract_strided_slice %18 {offsets = [12, 0], sizes = [1, 4], strides = [1, 1]} : vector<72x4xf32> to vector<1x4xf32>
    %22 = vector.extract_strided_slice %18 {offsets = [14, 0], sizes = [1, 4], strides = [1, 1]} : vector<72x4xf32> to vector<1x4xf32>
    %23 = vector.extract_strided_slice %18 {offsets = [36, 0], sizes = [1, 4], strides = [1, 1]} : vector<72x4xf32> to vector<1x4xf32>
    %24 = vector.extract_strided_slice %18 {offsets = [38, 0], sizes = [1, 4], strides = [1, 1]} : vector<72x4xf32> to vector<1x4xf32>
    %25 = vector.extract_strided_slice %18 {offsets = [48, 0], sizes = [1, 4], strides = [1, 1]} : vector<72x4xf32> to vector<1x4xf32>
    %26 = vector.extract_strided_slice %18 {offsets = [50, 0], sizes = [1, 4], strides = [1, 1]} : vector<72x4xf32> to vector<1x4xf32>
    %27 = tpu.concatenate %19, %20, %21, %22, %23, %24, %25, %26 in 0 : vector<1x4xf32>, vector<1x4xf32>, vector<1x4xf32>, vector<1x4xf32>, vector<1x4xf32>, vector<1x4xf32>, vector<1x4xf32>, vector<1x4xf32> -> vector<8x4xf32>
    %28 = vector.extract_strided_slice %18 {offsets = [1, 0], sizes = [1, 4], strides = [1, 1]} : vector<72x4xf32> to vector<1x4xf32>
    %29 = vector.extract_strided_slice %18 {offsets = [3, 0], sizes = [1, 4], strides = [1, 1]} : vector<72x4xf32> to vector<1x4xf32>
    %30 = vector.extract_strided_slice %18 {offsets = [13, 0], sizes = [1, 4], strides = [1, 1]} : vector<72x4xf32> to vector<1x4xf32>
    %31 = vector.extract_strided_slice %18 {offsets = [15, 0], sizes = [1, 4], strides = [1, 1]} : vector<72x4xf32> to vector<1x4xf32>
    %32 = vector.extract_strided_slice %18 {offsets = [37, 0], sizes = [1, 4], strides = [1, 1]} : vector<72x4xf32> to vector<1x4xf32>
    %33 = vector.extract_strided_slice %18 {offsets = [39, 0], sizes = [1, 4], strides = [1, 1]} : vector<72x4xf32> to vector<1x4xf32>
    %34 = vector.extract_strided_slice %18 {offsets = [49, 0], sizes = [1, 4], strides = [1, 1]} : vector<72x4xf32> to vector<1x4xf32>
    %35 = vector.extract_strided_slice %18 {offsets = [51, 0], sizes = [1, 4], strides = [1, 1]} : vector<72x4xf32> to vector<1x4xf32>
    %36 = tpu.concatenate %28, %29, %30, %31, %32, %33, %34, %35 in 0 : vector<1x4xf32>, vector<1x4xf32>, vector<1x4xf32>, vector<1x4xf32>, vector<1x4xf32>, vector<1x4xf32>, vector<1x4xf32>, vector<1x4xf32> -> vector<8x4xf32>
    %37 = vector.extract_strided_slice %18 {offsets = [2, 0], sizes = [1, 4], strides = [1, 1]} : vector<72x4xf32> to vector<1x4xf32>
    %38 = vector.extract_strided_slice %18 {offsets = [4, 0], sizes = [1, 4], strides = [1, 1]} : vector<72x4xf32> to vector<1x4xf32>
    %39 = vector.extract_strided_slice %18 {offsets = [14, 0], sizes = [1, 4], strides = [1, 1]} : vector<72x4xf32> to vector<1x4xf32>
    %40 = vector.extract_strided_slice %18 {offsets = [16, 0], sizes = [1, 4], strides = [1, 1]} : vector<72x4xf32> to vector<1x4xf32>
    %41 = vector.extract_strided_slice %18 {offsets = [38, 0], sizes = [1, 4], strides = [1, 1]} : vector<72x4xf32> to vector<1x4xf32>
    %42 = vector.extract_strided_slice %18 {offsets = [40, 0], sizes = [1, 4], strides = [1, 1]} : vector<72x4xf32> to vector<1x4xf32>
    %43 = vector.extract_strided_slice %18 {offsets = [50, 0], sizes = [1, 4], strides = [1, 1]} : vector<72x4xf32> to vector<1x4xf32>
    %44 = vector.extract_strided_slice %18 {offsets = [52, 0], sizes = [1, 4], strides = [1, 1]} : vector<72x4xf32> to vector<1x4xf32>
    %45 = tpu.concatenate %37, %38, %39, %40, %41, %42, %43, %44 in 0 : vector<1x4xf32>, vector<1x4xf32>, vector<1x4xf32>, vector<1x4xf32>, vector<1x4xf32>, vector<1x4xf32>, vector<1x4xf32>, vector<1x4xf32> -> vector<8x4xf32>
    %46 = vector.extract_strided_slice %18 {offsets = [6, 0], sizes = [1, 4], strides = [1, 1]} : vector<72x4xf32> to vector<1x4xf32>
    %47 = vector.extract_strided_slice %18 {offsets = [8, 0], sizes = [1, 4], strides = [1, 1]} : vector<72x4xf32> to vector<1x4xf32>
    %48 = vector.extract_strided_slice %18 {offsets = [18, 0], sizes = [1, 4], strides = [1, 1]} : vector<72x4xf32> to vector<1x4xf32>
    %49 = vector.extract_strided_slice %18 {offsets = [20, 0], sizes = [1, 4], strides = [1, 1]} : vector<72x4xf32> to vector<1x4xf32>
    %50 = vector.extract_strided_slice %18 {offsets = [42, 0], sizes = [1, 4], strides = [1, 1]} : vector<72x4xf32> to vector<1x4xf32>
    %51 = vector.extract_strided_slice %18 {offsets = [44, 0], sizes = [1, 4], strides = [1, 1]} : vector<72x4xf32> to vector<1x4xf32>
    %52 = vector.extract_strided_slice %18 {offsets = [54, 0], sizes = [1, 4], strides = [1, 1]} : vector<72x4xf32> to vector<1x4xf32>
    %53 = vector.extract_strided_slice %18 {offsets = [56, 0], sizes = [1, 4], strides = [1, 1]} : vector<72x4xf32> to vector<1x4xf32>
    %54 = tpu.concatenate %46, %47, %48, %49, %50, %51, %52, %53 in 0 : vector<1x4xf32>, vector<1x4xf32>, vector<1x4xf32>, vector<1x4xf32>, vector<1x4xf32>, vector<1x4xf32>, vector<1x4xf32>, vector<1x4xf32> -> vector<8x4xf32>
    %55 = vector.extract_strided_slice %18 {offsets = [7, 0], sizes = [1, 4], strides = [1, 1]} : vector<72x4xf32> to vector<1x4xf32>
    %56 = vector.extract_strided_slice %18 {offsets = [9, 0], sizes = [1, 4], strides = [1, 1]} : vector<72x4xf32> to vector<1x4xf32>
    %57 = vector.extract_strided_slice %18 {offsets = [19, 0], sizes = [1, 4], strides = [1, 1]} : vector<72x4xf32> to vector<1x4xf32>
    %58 = vector.extract_strided_slice %18 {offsets = [21, 0], sizes = [1, 4], strides = [1, 1]} : vector<72x4xf32> to vector<1x4xf32>
    %59 = vector.extract_strided_slice %18 {offsets = [43, 0], sizes = [1, 4], strides = [1, 1]} : vector<72x4xf32> to vector<1x4xf32>
    %60 = vector.extract_strided_slice %18 {offsets = [45, 0], sizes = [1, 4], strides = [1, 1]} : vector<72x4xf32> to vector<1x4xf32>
    %61 = vector.extract_strided_slice %18 {offsets = [55, 0], sizes = [1, 4], strides = [1, 1]} : vector<72x4xf32> to vector<1x4xf32>
    %62 = vector.extract_strided_slice %18 {offsets = [57, 0], sizes = [1, 4], strides = [1, 1]} : vector<72x4xf32> to vector<1x4xf32>
    %63 = tpu.concatenate %55, %56, %57, %58, %59, %60, %61, %62 in 0 : vector<1x4xf32>, vector<1x4xf32>, vector<1x4xf32>, vector<1x4xf32>, vector<1x4xf32>, vector<1x4xf32>, vector<1x4xf32>, vector<1x4xf32> -> vector<8x4xf32>
    %64 = vector.extract_strided_slice %18 {offsets = [8, 0], sizes = [1, 4], strides = [1, 1]} : vector<72x4xf32> to vector<1x4xf32>
    %65 = vector.extract_strided_slice %18 {offsets = [10, 0], sizes = [1, 4], strides = [1, 1]} : vector<72x4xf32> to vector<1x4xf32>
    %66 = vector.extract_strided_slice %18 {offsets = [20, 0], sizes = [1, 4], strides = [1, 1]} : vector<72x4xf32> to vector<1x4xf32>
    %67 = vector.extract_strided_slice %18 {offsets = [22, 0], sizes = [1, 4], strides = [1, 1]} : vector<72x4xf32> to vector<1x4xf32>
    %68 = vector.extract_strided_slice %18 {offsets = [44, 0], sizes = [1, 4], strides = [1, 1]} : vector<72x4xf32> to vector<1x4xf32>
    %69 = vector.extract_strided_slice %18 {offsets = [46, 0], sizes = [1, 4], strides = [1, 1]} : vector<72x4xf32> to vector<1x4xf32>
    %70 = vector.extract_strided_slice %18 {offsets = [56, 0], sizes = [1, 4], strides = [1, 1]} : vector<72x4xf32> to vector<1x4xf32>
    %71 = vector.extract_strided_slice %18 {offsets = [58, 0], sizes = [1, 4], strides = [1, 1]} : vector<72x4xf32> to vector<1x4xf32>
    %72 = tpu.concatenate %64, %65, %66, %67, %68, %69, %70, %71 in 0 : vector<1x4xf32>, vector<1x4xf32>, vector<1x4xf32>, vector<1x4xf32>, vector<1x4xf32>, vector<1x4xf32>, vector<1x4xf32>, vector<1x4xf32> -> vector<8x4xf32>
    %73 = vector.extract_strided_slice %18 {offsets = [12, 0], sizes = [1, 4], strides = [1, 1]} : vector<72x4xf32> to vector<1x4xf32>
    %74 = vector.extract_strided_slice %18 {offsets = [14, 0], sizes = [1, 4], strides = [1, 1]} : vector<72x4xf32> to vector<1x4xf32>
    %75 = vector.extract_strided_slice %18 {offsets = [24, 0], sizes = [1, 4], strides = [1, 1]} : vector<72x4xf32> to vector<1x4xf32>
    %76 = vector.extract_strided_slice %18 {offsets = [26, 0], sizes = [1, 4], strides = [1, 1]} : vector<72x4xf32> to vector<1x4xf32>
    %77 = vector.extract_strided_slice %18 {offsets = [48, 0], sizes = [1, 4], strides = [1, 1]} : vector<72x4xf32> to vector<1x4xf32>
    %78 = vector.extract_strided_slice %18 {offsets = [50, 0], sizes = [1, 4], strides = [1, 1]} : vector<72x4xf32> to vector<1x4xf32>
    %79 = vector.extract_strided_slice %18 {offsets = [60, 0], sizes = [1, 4], strides = [1, 1]} : vector<72x4xf32> to vector<1x4xf32>
    %80 = vector.extract_strided_slice %18 {offsets = [62, 0], sizes = [1, 4], strides = [1, 1]} : vector<72x4xf32> to vector<1x4xf32>
    %81 = tpu.concatenate %73, %74, %75, %76, %77, %78, %79, %80 in 0 : vector<1x4xf32>, vector<1x4xf32>, vector<1x4xf32>, vector<1x4xf32>, vector<1x4xf32>, vector<1x4xf32>, vector<1x4xf32>, vector<1x4xf32> -> vector<8x4xf32>
    %82 = vector.extract_strided_slice %18 {offsets = [13, 0], sizes = [1, 4], strides = [1, 1]} : vector<72x4xf32> to vector<1x4xf32>
    %83 = vector.extract_strided_slice %18 {offsets = [15, 0], sizes = [1, 4], strides = [1, 1]} : vector<72x4xf32> to vector<1x4xf32>
    %84 = vector.extract_strided_slice %18 {offsets = [25, 0], sizes = [1, 4], strides = [1, 1]} : vector<72x4xf32> to vector<1x4xf32>
    %85 = vector.extract_strided_slice %18 {offsets = [27, 0], sizes = [1, 4], strides = [1, 1]} : vector<72x4xf32> to vector<1x4xf32>
    %86 = vector.extract_strided_slice %18 {offsets = [49, 0], sizes = [1, 4], strides = [1, 1]} : vector<72x4xf32> to vector<1x4xf32>
    %87 = vector.extract_strided_slice %18 {offsets = [51, 0], sizes = [1, 4], strides = [1, 1]} : vector<72x4xf32> to vector<1x4xf32>
    %88 = vector.extract_strided_slice %18 {offsets = [61, 0], sizes = [1, 4], strides = [1, 1]} : vector<72x4xf32> to vector<1x4xf32>
    %89 = vector.extract_strided_slice %18 {offsets = [63, 0], sizes = [1, 4], strides = [1, 1]} : vector<72x4xf32> to vector<1x4xf32>
    %90 = tpu.concatenate %82, %83, %84, %85, %86, %87, %88, %89 in 0 : vector<1x4xf32>, vector<1x4xf32>, vector<1x4xf32>, vector<1x4xf32>, vector<1x4xf32>, vector<1x4xf32>, vector<1x4xf32>, vector<1x4xf32> -> vector<8x4xf32>
    %91 = vector.extract_strided_slice %18 {offsets = [14, 0], sizes = [1, 4], strides = [1, 1]} : vector<72x4xf32> to vector<1x4xf32>
    %92 = vector.extract_strided_slice %18 {offsets = [16, 0], sizes = [1, 4], strides = [1, 1]} : vector<72x4xf32> to vector<1x4xf32>
    %93 = vector.extract_strided_slice %18 {offsets = [26, 0], sizes = [1, 4], strides = [1, 1]} : vector<72x4xf32> to vector<1x4xf32>
    %94 = vector.extract_strided_slice %18 {offsets = [28, 0], sizes = [1, 4], strides = [1, 1]} : vector<72x4xf32> to vector<1x4xf32>
    %95 = vector.extract_strided_slice %18 {offsets = [50, 0], sizes = [1, 4], strides = [1, 1]} : vector<72x4xf32> to vector<1x4xf32>
    %96 = vector.extract_strided_slice %18 {offsets = [52, 0], sizes = [1, 4], strides = [1, 1]} : vector<72x4xf32> to vector<1x4xf32>
    %97 = vector.extract_strided_slice %18 {offsets = [62, 0], sizes = [1, 4], strides = [1, 1]} : vector<72x4xf32> to vector<1x4xf32>
    %98 = vector.extract_strided_slice %18 {offsets = [64, 0], sizes = [1, 4], strides = [1, 1]} : vector<72x4xf32> to vector<1x4xf32>
    %99 = tpu.concatenate %91, %92, %93, %94, %95, %96, %97, %98 in 0 : vector<1x4xf32>, vector<1x4xf32>, vector<1x4xf32>, vector<1x4xf32>, vector<1x4xf32>, vector<1x4xf32>, vector<1x4xf32>, vector<1x4xf32> -> vector<8x4xf32>
    %100 = tpu.concatenate %27, %36, %45, %54, %63, %72, %81, %90, %99 in 1 : vector<8x4xf32>, vector<8x4xf32>, vector<8x4xf32>, vector<8x4xf32>, vector<8x4xf32>, vector<8x4xf32>, vector<8x4xf32>, vector<8x4xf32>, vector<8x4xf32> -> vector<8x36xf32>
    %c0_2 = arith.constant 0 : index
    %c0_3 = arith.constant 0 : index
    %101 = vector.load %arg1[%c0_2, %c0_3] : memref<36x4xf32, #tpu.memory_space<vmem>>, vector<36x4xf32>
    %cst_4 = arith.constant dense<0.000000e+00> : vector<8x4xf32>
    %102 = tpu.matmul %100, %101, %cst_4 {dimension_numbers = #tpu.dot_dimension_numbers<[1], [0], [0], [1], [0, 0, 1, 1], [], []>, precision = #tpu.contract_precision<fp32>} : vector<8x36xf32>, vector<36x4xf32>, vector<8x4xf32> -> vector<8x4xf32>
    %c0_5 = arith.constant 0 : index
    %c0_6 = arith.constant 0 : index
    %103 = vector.load %arg2[%c0_5, %c0_6] : memref<1x4xf32, #tpu.memory_space<vmem>>, vector<1x4xf32>
    %104 = vector.broadcast %103 : vector<1x4xf32> to vector<8x4xf32>
    %105 = arith.addf %102, %104 : vector<8x4xf32>
    %cst_7 = arith.constant 0.000000e+00 : f32
    %106 = vector.broadcast %cst_7 : f32 to vector<8x4xf32>
    %107 = arith.maximumf %105, %106 : vector<8x4xf32>
    %cst_8 = arith.constant 0.000000e+00 : f32
    %108 = vector.broadcast %cst_8 : f32 to vector<1x4xf32>
    %109 = vector.shape_cast %108 : vector<1x4xf32> to vector<1x4xf32>
    %110 = vector.broadcast %109 : vector<1x4xf32> to vector<4x4xf32>
    %111 = vector.extract_strided_slice %107 {offsets = [0, 0], sizes = [2, 4], strides = [1, 1]} : vector<8x4xf32> to vector<2x4xf32>
    %112 = vector.extract_strided_slice %107 {offsets = [2, 0], sizes = [2, 4], strides = [1, 1]} : vector<8x4xf32> to vector<2x4xf32>
    %113 = vector.extract_strided_slice %107 {offsets = [4, 0], sizes = [2, 4], strides = [1, 1]} : vector<8x4xf32> to vector<2x4xf32>
    %114 = vector.extract_strided_slice %107 {offsets = [6, 0], sizes = [2, 4], strides = [1, 1]} : vector<8x4xf32> to vector<2x4xf32>
    %115 = tpu.concatenate %110, %108, %111, %108, %108, %112, %108, %110, %110, %108, %113, %108, %108, %114, %108, %110 in 0 : vector<4x4xf32>, vector<1x4xf32>, vector<2x4xf32>, vector<1x4xf32>, vector<1x4xf32>, vector<2x4xf32>, vector<1x4xf32>, vector<4x4xf32>, vector<4x4xf32>, vector<1x4xf32>, vector<2x4xf32>, vector<1x4xf32>, vector<1x4xf32>, vector<2x4xf32>, vector<1x4xf32>, vector<4x4xf32> -> vector<32x4xf32>
    %116 = vector.extract_strided_slice %115 {offsets = [0, 0], sizes = [1, 4], strides = [1, 1]} : vector<32x4xf32> to vector<1x4xf32>
    %117 = vector.extract_strided_slice %115 {offsets = [16, 0], sizes = [1, 4], strides = [1, 1]} : vector<32x4xf32> to vector<1x4xf32>
    %118 = tpu.concatenate %116, %117 in 0 : vector<1x4xf32>, vector<1x4xf32> -> vector<2x4xf32>
    %119 = vector.extract_strided_slice %115 {offsets = [1, 0], sizes = [1, 4], strides = [1, 1]} : vector<32x4xf32> to vector<1x4xf32>
    %120 = vector.extract_strided_slice %115 {offsets = [17, 0], sizes = [1, 4], strides = [1, 1]} : vector<32x4xf32> to vector<1x4xf32>
    %121 = tpu.concatenate %119, %120 in 0 : vector<1x4xf32>, vector<1x4xf32> -> vector<2x4xf32>
    %122 = vector.extract_strided_slice %115 {offsets = [2, 0], sizes = [1, 4], strides = [1, 1]} : vector<32x4xf32> to vector<1x4xf32>
    %123 = vector.extract_strided_slice %115 {offsets = [18, 0], sizes = [1, 4], strides = [1, 1]} : vector<32x4xf32> to vector<1x4xf32>
    %124 = tpu.concatenate %122, %123 in 0 : vector<1x4xf32>, vector<1x4xf32> -> vector<2x4xf32>
    %125 = vector.extract_strided_slice %115 {offsets = [4, 0], sizes = [1, 4], strides = [1, 1]} : vector<32x4xf32> to vector<1x4xf32>
    %126 = vector.extract_strided_slice %115 {offsets = [20, 0], sizes = [1, 4], strides = [1, 1]} : vector<32x4xf32> to vector<1x4xf32>
    %127 = tpu.concatenate %125, %126 in 0 : vector<1x4xf32>, vector<1x4xf32> -> vector<2x4xf32>
    %128 = vector.extract_strided_slice %115 {offsets = [5, 0], sizes = [1, 4], strides = [1, 1]} : vector<32x4xf32> to vector<1x4xf32>
    %129 = vector.extract_strided_slice %115 {offsets = [21, 0], sizes = [1, 4], strides = [1, 1]} : vector<32x4xf32> to vector<1x4xf32>
    %130 = tpu.concatenate %128, %129 in 0 : vector<1x4xf32>, vector<1x4xf32> -> vector<2x4xf32>
    %131 = vector.extract_strided_slice %115 {offsets = [6, 0], sizes = [1, 4], strides = [1, 1]} : vector<32x4xf32> to vector<1x4xf32>
    %132 = vector.extract_strided_slice %115 {offsets = [22, 0], sizes = [1, 4], strides = [1, 1]} : vector<32x4xf32> to vector<1x4xf32>
    %133 = tpu.concatenate %131, %132 in 0 : vector<1x4xf32>, vector<1x4xf32> -> vector<2x4xf32>
    %134 = vector.extract_strided_slice %115 {offsets = [8, 0], sizes = [1, 4], strides = [1, 1]} : vector<32x4xf32> to vector<1x4xf32>
    %135 = vector.extract_strided_slice %115 {offsets = [24, 0], sizes = [1, 4], strides = [1, 1]} : vector<32x4xf32> to vector<1x4xf32>
    %136 = tpu.concatenate %134, %135 in 0 : vector<1x4xf32>, vector<1x4xf32> -> vector<2x4xf32>
    %137 = vector.extract_strided_slice %115 {offsets = [9, 0], sizes = [1, 4], strides = [1, 1]} : vector<32x4xf32> to vector<1x4xf32>
    %138 = vector.extract_strided_slice %115 {offsets = [25, 0], sizes = [1, 4], strides = [1, 1]} : vector<32x4xf32> to vector<1x4xf32>
    %139 = tpu.concatenate %137, %138 in 0 : vector<1x4xf32>, vector<1x4xf32> -> vector<2x4xf32>
    %140 = vector.extract_strided_slice %115 {offsets = [10, 0], sizes = [1, 4], strides = [1, 1]} : vector<32x4xf32> to vector<1x4xf32>
    %141 = vector.extract_strided_slice %115 {offsets = [26, 0], sizes = [1, 4], strides = [1, 1]} : vector<32x4xf32> to vector<1x4xf32>
    %142 = tpu.concatenate %140, %141 in 0 : vector<1x4xf32>, vector<1x4xf32> -> vector<2x4xf32>
    %143 = tpu.concatenate %118, %121, %124, %127, %130, %133, %136, %139, %142 in 1 : vector<2x4xf32>, vector<2x4xf32>, vector<2x4xf32>, vector<2x4xf32>, vector<2x4xf32>, vector<2x4xf32>, vector<2x4xf32>, vector<2x4xf32>, vector<2x4xf32> -> vector<2x36xf32>
    %c0_9 = arith.constant 0 : index
    %c0_10 = arith.constant 0 : index
    %144 = vector.load %arg3[%c0_9, %c0_10] : memref<36x4xf32, #tpu.memory_space<vmem>>, vector<36x4xf32>
    %cst_11 = arith.constant dense<0.000000e+00> : vector<2x4xf32>
    %145 = tpu.matmul %143, %144, %cst_11 {dimension_numbers = #tpu.dot_dimension_numbers<[1], [0], [0], [1], [0, 0, 1, 1], [], []>, precision = #tpu.contract_precision<fp32>} : vector<2x36xf32>, vector<36x4xf32>, vector<2x4xf32> -> vector<2x4xf32>
    %c0_12 = arith.constant 0 : index
    %c0_13 = arith.constant 0 : index
    %146 = vector.load %arg4[%c0_12, %c0_13] : memref<1x4xf32, #tpu.memory_space<vmem>>, vector<1x4xf32>
    %147 = vector.broadcast %146 : vector<1x4xf32> to vector<2x4xf32>
    %148 = arith.addf %145, %147 : vector<2x4xf32>
    %cst_14 = arith.constant 0.000000e+00 : f32
    %149 = vector.broadcast %cst_14 : f32 to vector<2x4xf32>
    %150 = arith.maximumf %148, %149 : vector<2x4xf32>
    %c0_15 = arith.constant 0 : index
    %c0_16 = arith.constant 0 : index
    %151 = vector.load %arg5[%c0_15, %c0_16] : memref<4x4xf32, #tpu.memory_space<vmem>>, vector<4x4xf32>
    %cst_17 = arith.constant dense<0.000000e+00> : vector<2x4xf32>
    %152 = tpu.matmul %150, %151, %cst_17 {dimension_numbers = #tpu.dot_dimension_numbers<[1], [0], [0], [1], [0, 0, 1, 1], [], []>, precision = #tpu.contract_precision<fp32>} : vector<2x4xf32>, vector<4x4xf32>, vector<2x4xf32> -> vector<2x4xf32>
    %c0_18 = arith.constant 0 : index
    %c0_19 = arith.constant 0 : index
    %153 = vector.load %arg6[%c0_18, %c0_19] : memref<1x4xf32, #tpu.memory_space<vmem>>, vector<1x4xf32>
    %154 = vector.broadcast %153 : vector<1x4xf32> to vector<2x4xf32>
    %155 = arith.addf %152, %154 : vector<2x4xf32>
    %cst_20 = arith.constant 5.000000e-01 : f32
    %156 = vector.broadcast %cst_20 : f32 to vector<2x4xf32>
    %157 = arith.mulf %156, %155 : vector<2x4xf32>
    %158 = math.tanh %157 : vector<2x4xf32>
    %cst_21 = arith.constant 1.000000e+00 : f32
    %159 = vector.broadcast %cst_21 : f32 to vector<2x4xf32>
    %160 = arith.addf %158, %159 : vector<2x4xf32>
    %cst_22 = arith.constant 5.000000e-01 : f32
    %161 = vector.broadcast %cst_22 : f32 to vector<2x4xf32>
    %162 = arith.mulf %161, %160 : vector<2x4xf32>
    %cst_23 = arith.constant 0.000000e+00 : f32
    %163 = vector.broadcast %cst_23 : f32 to vector<1x4xf32>
    %164 = vector.shape_cast %163 : vector<1x4xf32> to vector<1x4xf32>
    %165 = vector.broadcast %164 : vector<1x4xf32> to vector<2x4xf32>
    %166 = vector.shape_cast %163 : vector<1x4xf32> to vector<1x4xf32>
    %167 = vector.broadcast %166 : vector<1x4xf32> to vector<4x4xf32>
    %168 = vector.extract_strided_slice %150 {offsets = [0, 0], sizes = [1, 4], strides = [1, 1]} : vector<2x4xf32> to vector<1x4xf32>
    %169 = vector.extract_strided_slice %150 {offsets = [1, 0], sizes = [1, 4], strides = [1, 1]} : vector<2x4xf32> to vector<1x4xf32>
    %170 = tpu.concatenate %167, %163, %168, %165, %167, %167, %167, %163, %169, %165, %167, %167 in 0 : vector<4x4xf32>, vector<1x4xf32>, vector<1x4xf32>, vector<2x4xf32>, vector<4x4xf32>, vector<4x4xf32>, vector<4x4xf32>, vector<1x4xf32>, vector<1x4xf32>, vector<2x4xf32>, vector<4x4xf32>, vector<4x4xf32> -> vector<32x4xf32>
    %171 = vector.extract_strided_slice %170 {offsets = [0, 0], sizes = [2, 4], strides = [1, 1]} : vector<32x4xf32> to vector<2x4xf32>
    %172 = vector.extract_strided_slice %170 {offsets = [4, 0], sizes = [2, 4], strides = [1, 1]} : vector<32x4xf32> to vector<2x4xf32>
    %173 = vector.extract_strided_slice %170 {offsets = [16, 0], sizes = [2, 4], strides = [1, 1]} : vector<32x4xf32> to vector<2x4xf32>
    %174 = vector.extract_strided_slice %170 {offsets = [20, 0], sizes = [2, 4], strides = [1, 1]} : vector<32x4xf32> to vector<2x4xf32>
    %175 = tpu.concatenate %171, %172, %173, %174 in 0 : vector<2x4xf32>, vector<2x4xf32>, vector<2x4xf32>, vector<2x4xf32> -> vector<8x4xf32>
    %176 = vector.extract_strided_slice %170 {offsets = [1, 0], sizes = [2, 4], strides = [1, 1]} : vector<32x4xf32> to vector<2x4xf32>
    %177 = vector.extract_strided_slice %170 {offsets = [5, 0], sizes = [2, 4], strides = [1, 1]} : vector<32x4xf32> to vector<2x4xf32>
    %178 = vector.extract_strided_slice %170 {offsets = [17, 0], sizes = [2, 4], strides = [1, 1]} : vector<32x4xf32> to vector<2x4xf32>
    %179 = vector.extract_strided_slice %170 {offsets = [21, 0], sizes = [2, 4], strides = [1, 1]} : vector<32x4xf32> to vector<2x4xf32>
    %180 = tpu.concatenate %176, %177, %178, %179 in 0 : vector<2x4xf32>, vector<2x4xf32>, vector<2x4xf32>, vector<2x4xf32> -> vector<8x4xf32>
    %181 = vector.extract_strided_slice %170 {offsets = [2, 0], sizes = [2, 4], strides = [1, 1]} : vector<32x4xf32> to vector<2x4xf32>
    %182 = vector.extract_strided_slice %170 {offsets = [6, 0], sizes = [2, 4], strides = [1, 1]} : vector<32x4xf32> to vector<2x4xf32>
    %183 = vector.extract_strided_slice %170 {offsets = [18, 0], sizes = [2, 4], strides = [1, 1]} : vector<32x4xf32> to vector<2x4xf32>
    %184 = vector.extract_strided_slice %170 {offsets = [22, 0], sizes = [2, 4], strides = [1, 1]} : vector<32x4xf32> to vector<2x4xf32>
    %185 = tpu.concatenate %181, %182, %183, %184 in 0 : vector<2x4xf32>, vector<2x4xf32>, vector<2x4xf32>, vector<2x4xf32> -> vector<8x4xf32>
    %186 = vector.extract_strided_slice %170 {offsets = [4, 0], sizes = [2, 4], strides = [1, 1]} : vector<32x4xf32> to vector<2x4xf32>
    %187 = vector.extract_strided_slice %170 {offsets = [8, 0], sizes = [2, 4], strides = [1, 1]} : vector<32x4xf32> to vector<2x4xf32>
    %188 = vector.extract_strided_slice %170 {offsets = [20, 0], sizes = [2, 4], strides = [1, 1]} : vector<32x4xf32> to vector<2x4xf32>
    %189 = vector.extract_strided_slice %170 {offsets = [24, 0], sizes = [2, 4], strides = [1, 1]} : vector<32x4xf32> to vector<2x4xf32>
    %190 = tpu.concatenate %186, %187, %188, %189 in 0 : vector<2x4xf32>, vector<2x4xf32>, vector<2x4xf32>, vector<2x4xf32> -> vector<8x4xf32>
    %191 = vector.extract_strided_slice %170 {offsets = [5, 0], sizes = [2, 4], strides = [1, 1]} : vector<32x4xf32> to vector<2x4xf32>
    %192 = vector.extract_strided_slice %170 {offsets = [9, 0], sizes = [2, 4], strides = [1, 1]} : vector<32x4xf32> to vector<2x4xf32>
    %193 = vector.extract_strided_slice %170 {offsets = [21, 0], sizes = [2, 4], strides = [1, 1]} : vector<32x4xf32> to vector<2x4xf32>
    %194 = vector.extract_strided_slice %170 {offsets = [25, 0], sizes = [2, 4], strides = [1, 1]} : vector<32x4xf32> to vector<2x4xf32>
    %195 = tpu.concatenate %191, %192, %193, %194 in 0 : vector<2x4xf32>, vector<2x4xf32>, vector<2x4xf32>, vector<2x4xf32> -> vector<8x4xf32>
    %196 = vector.extract_strided_slice %170 {offsets = [6, 0], sizes = [2, 4], strides = [1, 1]} : vector<32x4xf32> to vector<2x4xf32>
    %197 = vector.extract_strided_slice %170 {offsets = [10, 0], sizes = [2, 4], strides = [1, 1]} : vector<32x4xf32> to vector<2x4xf32>
    %198 = vector.extract_strided_slice %170 {offsets = [22, 0], sizes = [2, 4], strides = [1, 1]} : vector<32x4xf32> to vector<2x4xf32>
    %199 = vector.extract_strided_slice %170 {offsets = [26, 0], sizes = [2, 4], strides = [1, 1]} : vector<32x4xf32> to vector<2x4xf32>
    %200 = tpu.concatenate %196, %197, %198, %199 in 0 : vector<2x4xf32>, vector<2x4xf32>, vector<2x4xf32>, vector<2x4xf32> -> vector<8x4xf32>
    %201 = vector.extract_strided_slice %170 {offsets = [8, 0], sizes = [2, 4], strides = [1, 1]} : vector<32x4xf32> to vector<2x4xf32>
    %202 = vector.extract_strided_slice %170 {offsets = [12, 0], sizes = [2, 4], strides = [1, 1]} : vector<32x4xf32> to vector<2x4xf32>
    %203 = vector.extract_strided_slice %170 {offsets = [24, 0], sizes = [2, 4], strides = [1, 1]} : vector<32x4xf32> to vector<2x4xf32>
    %204 = vector.extract_strided_slice %170 {offsets = [28, 0], sizes = [2, 4], strides = [1, 1]} : vector<32x4xf32> to vector<2x4xf32>
    %205 = tpu.concatenate %201, %202, %203, %204 in 0 : vector<2x4xf32>, vector<2x4xf32>, vector<2x4xf32>, vector<2x4xf32> -> vector<8x4xf32>
    %206 = vector.extract_strided_slice %170 {offsets = [9, 0], sizes = [2, 4], strides = [1, 1]} : vector<32x4xf32> to vector<2x4xf32>
    %207 = vector.extract_strided_slice %170 {offsets = [13, 0], sizes = [2, 4], strides = [1, 1]} : vector<32x4xf32> to vector<2x4xf32>
    %208 = vector.extract_strided_slice %170 {offsets = [25, 0], sizes = [2, 4], strides = [1, 1]} : vector<32x4xf32> to vector<2x4xf32>
    %209 = vector.extract_strided_slice %170 {offsets = [29, 0], sizes = [2, 4], strides = [1, 1]} : vector<32x4xf32> to vector<2x4xf32>
    %210 = tpu.concatenate %206, %207, %208, %209 in 0 : vector<2x4xf32>, vector<2x4xf32>, vector<2x4xf32>, vector<2x4xf32> -> vector<8x4xf32>
    %211 = vector.extract_strided_slice %170 {offsets = [10, 0], sizes = [2, 4], strides = [1, 1]} : vector<32x4xf32> to vector<2x4xf32>
    %212 = vector.extract_strided_slice %170 {offsets = [14, 0], sizes = [2, 4], strides = [1, 1]} : vector<32x4xf32> to vector<2x4xf32>
    %213 = vector.extract_strided_slice %170 {offsets = [26, 0], sizes = [2, 4], strides = [1, 1]} : vector<32x4xf32> to vector<2x4xf32>
    %214 = vector.extract_strided_slice %170 {offsets = [30, 0], sizes = [2, 4], strides = [1, 1]} : vector<32x4xf32> to vector<2x4xf32>
    %215 = tpu.concatenate %211, %212, %213, %214 in 0 : vector<2x4xf32>, vector<2x4xf32>, vector<2x4xf32>, vector<2x4xf32> -> vector<8x4xf32>
    %216 = tpu.concatenate %175, %180, %185, %190, %195, %200, %205, %210, %215 in 1 : vector<8x4xf32>, vector<8x4xf32>, vector<8x4xf32>, vector<8x4xf32>, vector<8x4xf32>, vector<8x4xf32>, vector<8x4xf32>, vector<8x4xf32>, vector<8x4xf32> -> vector<8x36xf32>
    %c0_24 = arith.constant 0 : index
    %c0_25 = arith.constant 0 : index
    %217 = vector.load %arg7[%c0_24, %c0_25] : memref<36x4xf32, #tpu.memory_space<vmem>>, vector<36x4xf32>
    %cst_26 = arith.constant dense<0.000000e+00> : vector<8x4xf32>
    %218 = tpu.matmul %216, %217, %cst_26 {dimension_numbers = #tpu.dot_dimension_numbers<[1], [0], [0], [1], [0, 0, 1, 1], [], []>, precision = #tpu.contract_precision<fp32>} : vector<8x36xf32>, vector<36x4xf32>, vector<8x4xf32> -> vector<8x4xf32>
    %c0_27 = arith.constant 0 : index
    %c0_28 = arith.constant 0 : index
    %219 = vector.load %arg8[%c0_27, %c0_28] : memref<1x4xf32, #tpu.memory_space<vmem>>, vector<1x4xf32>
    %220 = vector.broadcast %219 : vector<1x4xf32> to vector<8x4xf32>
    %221 = arith.addf %218, %220 : vector<8x4xf32>
    %cst_29 = arith.constant 0.000000e+00 : f32
    %222 = vector.broadcast %cst_29 : f32 to vector<8x4xf32>
    %223 = arith.maximumf %221, %222 : vector<8x4xf32>
    %224 = vector.extract_strided_slice %162 {offsets = [0, 0], sizes = [1, 4], strides = [1, 1]} : vector<2x4xf32> to vector<1x4xf32>
    %225 = vector.shape_cast %224 : vector<1x4xf32> to vector<1x4xf32>
    %226 = vector.broadcast %225 : vector<1x4xf32> to vector<4x4xf32>
    %227 = vector.extract_strided_slice %162 {offsets = [1, 0], sizes = [1, 4], strides = [1, 1]} : vector<2x4xf32> to vector<1x4xf32>
    %228 = vector.shape_cast %227 : vector<1x4xf32> to vector<1x4xf32>
    %229 = vector.broadcast %228 : vector<1x4xf32> to vector<4x4xf32>
    %230 = tpu.concatenate %226, %229 in 0 : vector<4x4xf32>, vector<4x4xf32> -> vector<8x4xf32>
    %231 = arith.mulf %107, %230 : vector<8x4xf32>
    %232 = arith.addf %223, %231 : vector<8x4xf32>
    %cst_30 = arith.constant 0.000000e+00 : f32
    %233 = vector.broadcast %cst_30 : f32 to vector<1x4xf32>
    %234 = vector.shape_cast %233 : vector<1x4xf32> to vector<1x4xf32>
    %235 = vector.broadcast %234 : vector<1x4xf32> to vector<2x4xf32>
    %236 = vector.shape_cast %233 : vector<1x4xf32> to vector<1x4xf32>
    %237 = vector.broadcast %236 : vector<1x4xf32> to vector<6x4xf32>
    %238 = vector.extract_strided_slice %232 {offsets = [0, 0], sizes = [1, 4], strides = [1, 1]} : vector<8x4xf32> to vector<1x4xf32>
    %239 = vector.extract_strided_slice %232 {offsets = [1, 0], sizes = [1, 4], strides = [1, 1]} : vector<8x4xf32> to vector<1x4xf32>
    %240 = vector.extract_strided_slice %232 {offsets = [2, 0], sizes = [1, 4], strides = [1, 1]} : vector<8x4xf32> to vector<1x4xf32>
    %241 = vector.extract_strided_slice %232 {offsets = [3, 0], sizes = [1, 4], strides = [1, 1]} : vector<8x4xf32> to vector<1x4xf32>
    %242 = vector.extract_strided_slice %232 {offsets = [4, 0], sizes = [1, 4], strides = [1, 1]} : vector<8x4xf32> to vector<1x4xf32>
    %243 = vector.extract_strided_slice %232 {offsets = [5, 0], sizes = [1, 4], strides = [1, 1]} : vector<8x4xf32> to vector<1x4xf32>
    %244 = vector.extract_strided_slice %232 {offsets = [6, 0], sizes = [1, 4], strides = [1, 1]} : vector<8x4xf32> to vector<1x4xf32>
    %245 = vector.extract_strided_slice %232 {offsets = [7, 0], sizes = [1, 4], strides = [1, 1]} : vector<8x4xf32> to vector<1x4xf32>
    %246 = tpu.concatenate %237, %233, %238, %233, %239, %235, %237, %233, %240, %233, %241, %235, %237, %237, %237, %233 in 0 : vector<6x4xf32>, vector<1x4xf32>, vector<1x4xf32>, vector<1x4xf32>, vector<1x4xf32>, vector<2x4xf32>, vector<6x4xf32>, vector<1x4xf32>, vector<1x4xf32>, vector<1x4xf32>, vector<1x4xf32>, vector<2x4xf32>, vector<6x4xf32>, vector<6x4xf32>, vector<6x4xf32>, vector<1x4xf32> -> vector<43x4xf32>
    %247 = tpu.concatenate %242, %233, %243, %235, %237, %233, %244, %233, %245, %235, %237, %237 in 0 : vector<1x4xf32>, vector<1x4xf32>, vector<1x4xf32>, vector<2x4xf32>, vector<6x4xf32>, vector<1x4xf32>, vector<1x4xf32>, vector<1x4xf32>, vector<1x4xf32>, vector<2x4xf32>, vector<6x4xf32>, vector<6x4xf32> -> vector<29x4xf32>
    %248 = tpu.concatenate %246, %247 in 0 : vector<43x4xf32>, vector<29x4xf32> -> vector<72x4xf32>
    %249 = vector.extract_strided_slice %248 {offsets = [0, 0], sizes = [4, 4], strides = [1, 1]} : vector<72x4xf32> to vector<4x4xf32>
    %250 = vector.extract_strided_slice %248 {offsets = [6, 0], sizes = [4, 4], strides = [1, 1]} : vector<72x4xf32> to vector<4x4xf32>
    %251 = vector.extract_strided_slice %248 {offsets = [12, 0], sizes = [4, 4], strides = [1, 1]} : vector<72x4xf32> to vector<4x4xf32>
    %252 = vector.extract_strided_slice %248 {offsets = [18, 0], sizes = [4, 4], strides = [1, 1]} : vector<72x4xf32> to vector<4x4xf32>
    %253 = vector.extract_strided_slice %248 {offsets = [36, 0], sizes = [4, 4], strides = [1, 1]} : vector<72x4xf32> to vector<4x4xf32>
    %254 = vector.extract_strided_slice %248 {offsets = [42, 0], sizes = [4, 4], strides = [1, 1]} : vector<72x4xf32> to vector<4x4xf32>
    %255 = vector.extract_strided_slice %248 {offsets = [48, 0], sizes = [4, 4], strides = [1, 1]} : vector<72x4xf32> to vector<4x4xf32>
    %256 = vector.extract_strided_slice %248 {offsets = [54, 0], sizes = [4, 4], strides = [1, 1]} : vector<72x4xf32> to vector<4x4xf32>
    %257 = tpu.concatenate %249, %250, %251, %252, %253, %254, %255, %256 in 0 : vector<4x4xf32>, vector<4x4xf32>, vector<4x4xf32>, vector<4x4xf32>, vector<4x4xf32>, vector<4x4xf32>, vector<4x4xf32>, vector<4x4xf32> -> vector<32x4xf32>
    %258 = vector.extract_strided_slice %248 {offsets = [1, 0], sizes = [4, 4], strides = [1, 1]} : vector<72x4xf32> to vector<4x4xf32>
    %259 = vector.extract_strided_slice %248 {offsets = [7, 0], sizes = [4, 4], strides = [1, 1]} : vector<72x4xf32> to vector<4x4xf32>
    %260 = vector.extract_strided_slice %248 {offsets = [13, 0], sizes = [4, 4], strides = [1, 1]} : vector<72x4xf32> to vector<4x4xf32>
    %261 = vector.extract_strided_slice %248 {offsets = [19, 0], sizes = [4, 4], strides = [1, 1]} : vector<72x4xf32> to vector<4x4xf32>
    %262 = vector.extract_strided_slice %248 {offsets = [37, 0], sizes = [4, 4], strides = [1, 1]} : vector<72x4xf32> to vector<4x4xf32>
    %263 = vector.extract_strided_slice %248 {offsets = [43, 0], sizes = [4, 4], strides = [1, 1]} : vector<72x4xf32> to vector<4x4xf32>
    %264 = vector.extract_strided_slice %248 {offsets = [49, 0], sizes = [4, 4], strides = [1, 1]} : vector<72x4xf32> to vector<4x4xf32>
    %265 = vector.extract_strided_slice %248 {offsets = [55, 0], sizes = [4, 4], strides = [1, 1]} : vector<72x4xf32> to vector<4x4xf32>
    %266 = tpu.concatenate %258, %259, %260, %261, %262, %263, %264, %265 in 0 : vector<4x4xf32>, vector<4x4xf32>, vector<4x4xf32>, vector<4x4xf32>, vector<4x4xf32>, vector<4x4xf32>, vector<4x4xf32>, vector<4x4xf32> -> vector<32x4xf32>
    %267 = vector.extract_strided_slice %248 {offsets = [2, 0], sizes = [4, 4], strides = [1, 1]} : vector<72x4xf32> to vector<4x4xf32>
    %268 = vector.extract_strided_slice %248 {offsets = [8, 0], sizes = [4, 4], strides = [1, 1]} : vector<72x4xf32> to vector<4x4xf32>
    %269 = vector.extract_strided_slice %248 {offsets = [14, 0], sizes = [4, 4], strides = [1, 1]} : vector<72x4xf32> to vector<4x4xf32>
    %270 = vector.extract_strided_slice %248 {offsets = [20, 0], sizes = [4, 4], strides = [1, 1]} : vector<72x4xf32> to vector<4x4xf32>
    %271 = vector.extract_strided_slice %248 {offsets = [38, 0], sizes = [4, 4], strides = [1, 1]} : vector<72x4xf32> to vector<4x4xf32>
    %272 = vector.extract_strided_slice %248 {offsets = [44, 0], sizes = [4, 4], strides = [1, 1]} : vector<72x4xf32> to vector<4x4xf32>
    %273 = vector.extract_strided_slice %248 {offsets = [50, 0], sizes = [4, 4], strides = [1, 1]} : vector<72x4xf32> to vector<4x4xf32>
    %274 = vector.extract_strided_slice %248 {offsets = [56, 0], sizes = [4, 4], strides = [1, 1]} : vector<72x4xf32> to vector<4x4xf32>
    %275 = tpu.concatenate %267, %268, %269, %270, %271, %272, %273, %274 in 0 : vector<4x4xf32>, vector<4x4xf32>, vector<4x4xf32>, vector<4x4xf32>, vector<4x4xf32>, vector<4x4xf32>, vector<4x4xf32>, vector<4x4xf32> -> vector<32x4xf32>
    %276 = vector.extract_strided_slice %248 {offsets = [6, 0], sizes = [4, 4], strides = [1, 1]} : vector<72x4xf32> to vector<4x4xf32>
    %277 = vector.extract_strided_slice %248 {offsets = [12, 0], sizes = [4, 4], strides = [1, 1]} : vector<72x4xf32> to vector<4x4xf32>
    %278 = vector.extract_strided_slice %248 {offsets = [18, 0], sizes = [4, 4], strides = [1, 1]} : vector<72x4xf32> to vector<4x4xf32>
    %279 = vector.extract_strided_slice %248 {offsets = [24, 0], sizes = [4, 4], strides = [1, 1]} : vector<72x4xf32> to vector<4x4xf32>
    %280 = vector.extract_strided_slice %248 {offsets = [42, 0], sizes = [4, 4], strides = [1, 1]} : vector<72x4xf32> to vector<4x4xf32>
    %281 = vector.extract_strided_slice %248 {offsets = [48, 0], sizes = [4, 4], strides = [1, 1]} : vector<72x4xf32> to vector<4x4xf32>
    %282 = vector.extract_strided_slice %248 {offsets = [54, 0], sizes = [4, 4], strides = [1, 1]} : vector<72x4xf32> to vector<4x4xf32>
    %283 = vector.extract_strided_slice %248 {offsets = [60, 0], sizes = [4, 4], strides = [1, 1]} : vector<72x4xf32> to vector<4x4xf32>
    %284 = tpu.concatenate %276, %277, %278, %279, %280, %281, %282, %283 in 0 : vector<4x4xf32>, vector<4x4xf32>, vector<4x4xf32>, vector<4x4xf32>, vector<4x4xf32>, vector<4x4xf32>, vector<4x4xf32>, vector<4x4xf32> -> vector<32x4xf32>
    %285 = vector.extract_strided_slice %248 {offsets = [7, 0], sizes = [4, 4], strides = [1, 1]} : vector<72x4xf32> to vector<4x4xf32>
    %286 = vector.extract_strided_slice %248 {offsets = [13, 0], sizes = [4, 4], strides = [1, 1]} : vector<72x4xf32> to vector<4x4xf32>
    %287 = vector.extract_strided_slice %248 {offsets = [19, 0], sizes = [4, 4], strides = [1, 1]} : vector<72x4xf32> to vector<4x4xf32>
    %288 = vector.extract_strided_slice %248 {offsets = [25, 0], sizes = [4, 4], strides = [1, 1]} : vector<72x4xf32> to vector<4x4xf32>
    %289 = vector.extract_strided_slice %248 {offsets = [43, 0], sizes = [4, 4], strides = [1, 1]} : vector<72x4xf32> to vector<4x4xf32>
    %290 = vector.extract_strided_slice %248 {offsets = [49, 0], sizes = [4, 4], strides = [1, 1]} : vector<72x4xf32> to vector<4x4xf32>
    %291 = vector.extract_strided_slice %248 {offsets = [55, 0], sizes = [4, 4], strides = [1, 1]} : vector<72x4xf32> to vector<4x4xf32>
    %292 = vector.extract_strided_slice %248 {offsets = [61, 0], sizes = [4, 4], strides = [1, 1]} : vector<72x4xf32> to vector<4x4xf32>
    %293 = tpu.concatenate %285, %286, %287, %288, %289, %290, %291, %292 in 0 : vector<4x4xf32>, vector<4x4xf32>, vector<4x4xf32>, vector<4x4xf32>, vector<4x4xf32>, vector<4x4xf32>, vector<4x4xf32>, vector<4x4xf32> -> vector<32x4xf32>
    %294 = vector.extract_strided_slice %248 {offsets = [8, 0], sizes = [4, 4], strides = [1, 1]} : vector<72x4xf32> to vector<4x4xf32>
    %295 = vector.extract_strided_slice %248 {offsets = [14, 0], sizes = [4, 4], strides = [1, 1]} : vector<72x4xf32> to vector<4x4xf32>
    %296 = vector.extract_strided_slice %248 {offsets = [20, 0], sizes = [4, 4], strides = [1, 1]} : vector<72x4xf32> to vector<4x4xf32>
    %297 = vector.extract_strided_slice %248 {offsets = [26, 0], sizes = [4, 4], strides = [1, 1]} : vector<72x4xf32> to vector<4x4xf32>
    %298 = vector.extract_strided_slice %248 {offsets = [44, 0], sizes = [4, 4], strides = [1, 1]} : vector<72x4xf32> to vector<4x4xf32>
    %299 = vector.extract_strided_slice %248 {offsets = [50, 0], sizes = [4, 4], strides = [1, 1]} : vector<72x4xf32> to vector<4x4xf32>
    %300 = vector.extract_strided_slice %248 {offsets = [56, 0], sizes = [4, 4], strides = [1, 1]} : vector<72x4xf32> to vector<4x4xf32>
    %301 = vector.extract_strided_slice %248 {offsets = [62, 0], sizes = [4, 4], strides = [1, 1]} : vector<72x4xf32> to vector<4x4xf32>
    %302 = tpu.concatenate %294, %295, %296, %297, %298, %299, %300, %301 in 0 : vector<4x4xf32>, vector<4x4xf32>, vector<4x4xf32>, vector<4x4xf32>, vector<4x4xf32>, vector<4x4xf32>, vector<4x4xf32>, vector<4x4xf32> -> vector<32x4xf32>
    %303 = vector.extract_strided_slice %248 {offsets = [12, 0], sizes = [4, 4], strides = [1, 1]} : vector<72x4xf32> to vector<4x4xf32>
    %304 = vector.extract_strided_slice %248 {offsets = [18, 0], sizes = [4, 4], strides = [1, 1]} : vector<72x4xf32> to vector<4x4xf32>
    %305 = vector.extract_strided_slice %248 {offsets = [24, 0], sizes = [4, 4], strides = [1, 1]} : vector<72x4xf32> to vector<4x4xf32>
    %306 = vector.extract_strided_slice %248 {offsets = [30, 0], sizes = [4, 4], strides = [1, 1]} : vector<72x4xf32> to vector<4x4xf32>
    %307 = vector.extract_strided_slice %248 {offsets = [48, 0], sizes = [4, 4], strides = [1, 1]} : vector<72x4xf32> to vector<4x4xf32>
    %308 = vector.extract_strided_slice %248 {offsets = [54, 0], sizes = [4, 4], strides = [1, 1]} : vector<72x4xf32> to vector<4x4xf32>
    %309 = vector.extract_strided_slice %248 {offsets = [60, 0], sizes = [4, 4], strides = [1, 1]} : vector<72x4xf32> to vector<4x4xf32>
    %310 = vector.extract_strided_slice %248 {offsets = [66, 0], sizes = [4, 4], strides = [1, 1]} : vector<72x4xf32> to vector<4x4xf32>
    %311 = tpu.concatenate %303, %304, %305, %306, %307, %308, %309, %310 in 0 : vector<4x4xf32>, vector<4x4xf32>, vector<4x4xf32>, vector<4x4xf32>, vector<4x4xf32>, vector<4x4xf32>, vector<4x4xf32>, vector<4x4xf32> -> vector<32x4xf32>
    %312 = vector.extract_strided_slice %248 {offsets = [13, 0], sizes = [4, 4], strides = [1, 1]} : vector<72x4xf32> to vector<4x4xf32>
    %313 = vector.extract_strided_slice %248 {offsets = [19, 0], sizes = [4, 4], strides = [1, 1]} : vector<72x4xf32> to vector<4x4xf32>
    %314 = vector.extract_strided_slice %248 {offsets = [25, 0], sizes = [4, 4], strides = [1, 1]} : vector<72x4xf32> to vector<4x4xf32>
    %315 = vector.extract_strided_slice %248 {offsets = [31, 0], sizes = [4, 4], strides = [1, 1]} : vector<72x4xf32> to vector<4x4xf32>
    %316 = vector.extract_strided_slice %248 {offsets = [49, 0], sizes = [4, 4], strides = [1, 1]} : vector<72x4xf32> to vector<4x4xf32>
    %317 = vector.extract_strided_slice %248 {offsets = [55, 0], sizes = [4, 4], strides = [1, 1]} : vector<72x4xf32> to vector<4x4xf32>
    %318 = vector.extract_strided_slice %248 {offsets = [61, 0], sizes = [4, 4], strides = [1, 1]} : vector<72x4xf32> to vector<4x4xf32>
    %319 = vector.extract_strided_slice %248 {offsets = [67, 0], sizes = [4, 4], strides = [1, 1]} : vector<72x4xf32> to vector<4x4xf32>
    %320 = tpu.concatenate %312, %313, %314, %315, %316, %317, %318, %319 in 0 : vector<4x4xf32>, vector<4x4xf32>, vector<4x4xf32>, vector<4x4xf32>, vector<4x4xf32>, vector<4x4xf32>, vector<4x4xf32>, vector<4x4xf32> -> vector<32x4xf32>
    %321 = vector.extract_strided_slice %248 {offsets = [14, 0], sizes = [4, 4], strides = [1, 1]} : vector<72x4xf32> to vector<4x4xf32>
    %322 = vector.extract_strided_slice %248 {offsets = [20, 0], sizes = [4, 4], strides = [1, 1]} : vector<72x4xf32> to vector<4x4xf32>
    %323 = vector.extract_strided_slice %248 {offsets = [26, 0], sizes = [4, 4], strides = [1, 1]} : vector<72x4xf32> to vector<4x4xf32>
    %324 = vector.extract_strided_slice %248 {offsets = [32, 0], sizes = [4, 4], strides = [1, 1]} : vector<72x4xf32> to vector<4x4xf32>
    %325 = vector.extract_strided_slice %248 {offsets = [50, 0], sizes = [4, 4], strides = [1, 1]} : vector<72x4xf32> to vector<4x4xf32>
    %326 = vector.extract_strided_slice %248 {offsets = [56, 0], sizes = [4, 4], strides = [1, 1]} : vector<72x4xf32> to vector<4x4xf32>
    %327 = vector.extract_strided_slice %248 {offsets = [62, 0], sizes = [4, 4], strides = [1, 1]} : vector<72x4xf32> to vector<4x4xf32>
    %328 = vector.extract_strided_slice %248 {offsets = [68, 0], sizes = [4, 4], strides = [1, 1]} : vector<72x4xf32> to vector<4x4xf32>
    %329 = tpu.concatenate %321, %322, %323, %324, %325, %326, %327, %328 in 0 : vector<4x4xf32>, vector<4x4xf32>, vector<4x4xf32>, vector<4x4xf32>, vector<4x4xf32>, vector<4x4xf32>, vector<4x4xf32>, vector<4x4xf32> -> vector<32x4xf32>
    %330 = tpu.concatenate %257, %266, %275, %284, %293, %302, %311, %320, %329 in 1 : vector<32x4xf32>, vector<32x4xf32>, vector<32x4xf32>, vector<32x4xf32>, vector<32x4xf32>, vector<32x4xf32>, vector<32x4xf32>, vector<32x4xf32>, vector<32x4xf32> -> vector<32x36xf32>
    %c0_31 = arith.constant 0 : index
    %c0_32 = arith.constant 0 : index
    %331 = vector.load %arg9[%c0_31, %c0_32] : memref<36x4xf32, #tpu.memory_space<vmem>>, vector<36x4xf32>
    %cst_33 = arith.constant dense<0.000000e+00> : vector<32x4xf32>
    %332 = tpu.matmul %330, %331, %cst_33 {dimension_numbers = #tpu.dot_dimension_numbers<[1], [0], [0], [1], [0, 0, 1, 1], [], []>, precision = #tpu.contract_precision<fp32>} : vector<32x36xf32>, vector<36x4xf32>, vector<32x4xf32> -> vector<32x4xf32>
    %c0_34 = arith.constant 0 : index
    %c0_35 = arith.constant 0 : index
    %333 = vector.load %arg10[%c0_34, %c0_35] : memref<1x4xf32, #tpu.memory_space<vmem>>, vector<1x4xf32>
    %334 = vector.broadcast %333 : vector<1x4xf32> to vector<32x4xf32>
    %335 = arith.addf %332, %334 : vector<32x4xf32>
    %cst_36 = arith.constant 0.000000e+00 : f32
    %336 = vector.broadcast %cst_36 : f32 to vector<32x4xf32>
    %337 = arith.maximumf %335, %336 : vector<32x4xf32>
    %338 = vector.extract_strided_slice %162 {offsets = [0, 0], sizes = [1, 4], strides = [1, 1]} : vector<2x4xf32> to vector<1x4xf32>
    %339 = vector.shape_cast %338 : vector<1x4xf32> to vector<1x4xf32>
    %340 = vector.broadcast %339 : vector<1x4xf32> to vector<16x4xf32>
    %341 = vector.extract_strided_slice %162 {offsets = [1, 0], sizes = [1, 4], strides = [1, 1]} : vector<2x4xf32> to vector<1x4xf32>
    %342 = vector.shape_cast %341 : vector<1x4xf32> to vector<1x4xf32>
    %343 = vector.broadcast %342 : vector<1x4xf32> to vector<16x4xf32>
    %344 = tpu.concatenate %340, %343 in 0 : vector<16x4xf32>, vector<16x4xf32> -> vector<32x4xf32>
    %345 = arith.mulf %337, %344 : vector<32x4xf32>
    %346 = arith.addf %4, %345 : vector<32x4xf32>
    %347 = vector.extract_strided_slice %346 {offsets = [0, 0], sizes = [16, 4], strides = [1, 1]} : vector<32x4xf32> to vector<16x4xf32>
    %348 = tpu.transpose %347, [1, 0] : vector<16x4xf32> -> vector<4x16xf32>
    %349 = vector.extract_strided_slice %346 {offsets = [16, 0], sizes = [16, 4], strides = [1, 1]} : vector<32x4xf32> to vector<16x4xf32>
    %350 = tpu.transpose %349, [1, 0] : vector<16x4xf32> -> vector<4x16xf32>
    %351 = tpu.concatenate %348, %350 in 0 : vector<4x16xf32>, vector<4x16xf32> -> vector<8x16xf32>
    %c0_37 = arith.constant 0 : index
    %c0_38 = arith.constant 0 : index
    %352 = vector.load %arg11[%c0_37, %c0_38] : memref<8x16xf32, #tpu.memory_space<vmem>>, vector<8x16xf32>
    tpu.vector_store %arg11[%c0_37, %c0_38], %351 {strides = array<i32>} : memref<8x16xf32, #tpu.memory_space<vmem>>, vector<8x16xf32>,
    return
  }
}

</mosaic_0001>

<bundles_post_ra>
// kernel: panet_pallas.1
= control target key start
LH: loop header
LB: loop body
LE: loop exit
PB: predicated region body
PF: predicated region fallthrough
CT: control target
= control target key end

     0   :  { %vm114_vm0 = vcmask 1046528   ;;  %vm116_vm1 = vcmask 1042432   ;;  %vm118_vm2 = vcmask 1043456   ;;  %vm122_vm3 = vcmask 1040384   ;;  %s2141_s21 = smov 12   ;;  %s2142_s22 = smov 28   ;;  %s2941_s0 = inlined_call_operand.vmem [shape: f32[8,16], index: 0, kind: input, shape index: {}]   ;;  %s2942_s1 = inlined_call_operand.vmem [shape: f32[36,4], index: 1, kind: input, shape index: {}]   ;;  %s2943_s2 = inlined_call_operand.vmem [shape: f32[1,4], index: 2, kind: input, shape index: {}]   ;;  %s2944_s3 = inlined_call_operand.vmem [shape: f32[36,4], index: 3, kind: input, shape index: {}]   ;;  %s2945_s4 = inlined_call_operand.vmem [shape: f32[1,4], index: 4, kind: input, shape index: {}]   ;;  %s2946_s5 = inlined_call_operand.vmem [shape: f32[4,4], index: 5, kind: input, shape index: {}]   ;;  %s2947_s6 = inlined_call_operand.vmem [shape: f32[1,4], index: 6, kind: input, shape index: {}]   ;;  %s2948_s7 = inlined_call_operand.vmem [shape: f32[36,4], index: 7, kind: input, shape index: {}]   ;;  %s2949_s8 = inlined_call_operand.vmem [shape: f32[1,4], index: 8, kind: input, shape index: {}]   ;;  %s2950_s9 = inlined_call_operand.vmem [shape: f32[36,4], index: 9, kind: input, shape index: {}]   ;;  %s2951_s10 = inlined_call_operand.vmem [shape: f32[1,4], index: 10, kind: input, shape index: {}]   ;;  %s2952_s11 = inlined_call_operand.vmem [shape: f32[8,16], index: 11, kind: output, shape index: {}]  }
   0x1   :  { %v38_v0 = vld [vmem:[%s2941_s0] sm:$0xf]  ;;  %v71_v1 = vld [vmem:[%s2941_s0 + $0x4] sm:$0xf]  ;;  %vm120_vm4 = vcmask 1044480   ;;  %vm124_vm5 = vcmask 1041408  }
   0x2   :  { %39 = vxpose.xlu0.b32.start.end [1/1] (short) (narrow) %v38_v0, 16  ;;  %vm130_vm6 = vcmask 1045504   ;;  %v2139_v31 = vmov 0.0   ;;  %s2140_s0 = smov 4   ;;  %s2143_s23 = smov 8   ;;  %vm342_vm7 = vcmask 31744  }
   0x3   :  { %v2255_v32 = vrot.slane %v2139_v31, 1  ;;  %v2280_v47 = vrot.slane %v2139_v31, 2  ;;  %s2144_s24 = smov 16   ;;  %s2145_s25 = smov 20   ;;  %vm344_vm8 = vcmask 64512   ;;  %vm346_vm9 = vcmask 97280  }
   0x4   :  { %s2146_s26 = smov 24   ;;  %s2147_s27 = smov 32   ;;  %vm348_vm10 = vcmask 130048   ;;  %vm350_vm11 = vcmask 162816   ;;  %vm352_vm12 = vcmask 195584   ;;  %vm354_vm13 = vcmask 228352  }
   0x5   :  { %vm356_vm14 = vcmask 261120   ;;  %vm367_vm15 = vcmask 293888  }
  0x12   :  { %72 = vxpose.xlu0.b32.start.end [1/1] (short) (narrow) %v71_v1, 16 }
  0xa6   :  { %v2214_v2 = vpop.trf.xlu0 }
  0xa7   :  { %v105_v3 = vrot.slane %v2214_v2, 1  ;;  %v107_v10 = vrot.slane %v2214_v2, 7 }
  0xa9   :  { %v2218_v4 = vsel %vm114_vm0, 0.0, %v105_v3  ;;  %v117_v6 = vsel %vm116_vm1, %v105_v3, 0.0  ;;  %v123_v14 = vsel %vm122_vm3, %v107_v10, 0.0 }
  0xaa   :  { %v165_v5 = vrot.slane %v2218_v4, 1  ;;  %v119_v8 = vsel %vm118_vm2, %v117_v6, 0.0  ;;  %v185_v12 = vrot.slane %v2218_v4, 2  ;;  %v125_v18 = vsel %vm124_vm5, %v123_v14, 0.0 }
  0xab   :  { %v2229_v11 = vsel %vm120_vm4, %v119_v8, %v107_v10  ;;  %v200_v22 = vrot.slane %v2218_v4, 3  ;;  %v217_v34 = vrot.slane %v2218_v4, 6  ;;  %v236_v35 = vrot.slane %v2218_v4, 7 }
  0xac   :  { %v178_v7 = vsel %vm122_vm3, %v2218_v4, %v165_v5  ;;  %v170_v16 = vrot.slane %v2229_v11, 3  ;;  %v193_v17 = vsel %vm122_vm3, %v165_v5, %v185_v12  ;;  %v168_v21 = vrot.slane %v2229_v11, 2 }
  0xad   :  { %v2247_v25 = vrot.slane %v2229_v11, 4  ;;  %v219_v33 = vrot.slane %v2229_v11, 7  ;;  %v210_v40 = vsel %vm122_vm3, %v185_v12, %v200_v22  ;;  %v266_v44 = vrot.slane %v2229_v11, 5 }
  0xae   :  { %v2225_v9 = vpop.trf.xlu0  ;;  %v194_v28 = vsel %vm124_vm5, %v193_v17, %v170_v16  ;;  %v179_v37 = vsel %vm124_vm5, %v178_v7, %v168_v21  ;;  %v284_v45 = vrot.slane %v2229_v11, 6  ;;  %v244_v60 = vsel %vm122_vm3, %v236_v35, %v2229_v11 }
  0xaf   :  { %v112_v13 = vrot.slane %v2225_v9, 3  ;;  %v110_v15 = vrot.slane %v2225_v9, 5  ;;  %v195_v39 = vsel %vm116_vm1, %v194_v28, %v2247_v25  ;;  %v2268_v41 = vsel %vm116_vm1, %v179_v37, %v170_v16 }
  0xb0   :  { %v229_v48 = vsel %vm122_vm3, %v217_v34, %v219_v33  ;;  %v196_v50 = vsel %vm118_vm2, %v195_v39, %v2255_v32  ;;  %v211_v53 = vsel %vm124_vm5, %v210_v40, %v2247_v25  ;;  %v288_v59 = vsel %vm122_vm3, %v266_v44, %v284_v45 }
  0xb1   :  { %v128_v19 = vsel %vm122_vm3, 0.0, %v112_v13  ;;  %v126_v26 = vsel %vm116_vm1, %v125_v18, %v110_v15  ;;  %v251_v61 = vrot.slane %v2229_v11, 1  ;;  %v197_v0 = vsel %vm120_vm4, %v196_v50, %v2280_v47 }
  0xb2   :  { %v129_v29 = vsel %vm120_vm4, %v128_v19, 0.0  ;;  %v2262_v38 = vsel %vm114_vm0, %v126_v26, 0.0 }
  0xb3   :  { %v2271_v42 = vsel %vm130_vm6, %v129_v29, 0.0  ;;  %v221_v51 = vrot.slane %v2262_v38, 1  ;;  %v230_v52 = vsel %vm124_vm5, %v229_v48, %v2262_v38  ;;  %v203_v1 = vrot.slane %v2262_v38, 5 }
  0xb4   :  { %v271_v54 = vrot.slane %v2271_v42, 7  ;;  %v269_v7 = vrot.slane %v2271_v42, 6  ;;  %v238_v15 = vrot.slane %v2262_v38, 2 }
  0xb5   :  { %v231_v6 = vsel %vm116_vm1, %v230_v52, %v221_v51  ;;  %v245_v16 = vsel %vm124_vm5, %v244_v60, %v221_v51  ;;  %v212_v21 = vsel %vm116_vm1, %v211_v53, %v203_v1  ;;  %v181_v52 = vsel %vm118_vm2, %v2268_v41, 0.0 }
  0xb6   :  { %v2239_v20 = vpop.trf.xlu0  ;;  %v289_v12 = vsel %vm124_vm5, %v288_v59, %v271_v54  ;;  %v246_v40 = vsel %vm116_vm1, %v245_v16, %v238_v15  ;;  %v295_v53 = vrot.slane %v2262_v38, 7 }
  0xb7   :  { %v133_v23 = vrot.slane %v2239_v20, 6  ;;  %v140_v24 = vsel %vm118_vm2, %v2239_v20, 0.0  ;;  %v290_v26 = vsel %vm116_vm1, %v289_v12, %v2271_v42 }
  0xb8   :  { %v141_v27 = vsel %vm120_vm4, %v140_v24, 0.0  ;;  %v303_v1 = vsel %vm122_vm3, %v284_v45, %v295_v53  ;;  %v297_v45 = vrot.slane %v2271_v42, 1 }
  0xb9   :  { %v142_v30 = vsel %vm130_vm6, %v141_v27, %v133_v23  ;;  %v143_v46 = vsel %vm124_vm5, %v133_v23, 0.0 }
  0xba   :  { %v153_v36 = vrot.slane %v142_v30, 5  ;;  %v144_v58 = vsel %vm116_vm1, %v143_v46, 0.0  ;;  %v259_v46 = vsel %vm122_vm3, %v2229_v11, %v251_v61 }
  0xbb   :  { %v260_v59 = vsel %vm124_vm5, %v259_v46, %v238_v15  ;;  %v304_v15 = vsel %vm124_vm5, %v303_v1, %v2271_v42 }
  0xbc   :  { %v2274_v43 = vsel %vm116_vm1, 0.0, %v153_v36 }
  0xbd   :  { %v223_v57 = vrot.slane %v2274_v43, 6  ;;  %v225_v5 = vrot.slane %v2274_v43, 7 }
  0xbe   :  { %v2283_v49 = vpop.trf.xlu0 }
  0xbf   :  { %v136_v55 = vrot.slane %v2283_v49, 4  ;;  %v138_v56 = vrot.slane %v2283_v49, 2  ;;  %v232_v10 = vsel %vm118_vm2, %v231_v6, %v223_v57  ;;  %v247_v51 = vsel %vm118_vm2, %v246_v40, %v225_v5 }
  0xc0   :  { %v233_v23 = vsel %vm120_vm4, %v232_v10, %v225_v5  ;;  %v277_v57 = vsel %vm122_vm3, %v2247_v25, %v266_v44  ;;  %v255_v5 = vrot.slane %v2274_v43, 1 }
  0xc1   :  { %v145_v62 = vsel %vm118_vm2, %v144_v58, %v136_v55  ;;  %v146_v63 = vsel %vm124_vm5, 0.0, %v138_v56  ;;  %v213_v55 = vsel %vm118_vm2, %v212_v21, %v2280_v47  ;;  %v253_v56 = vrot.slane %v2262_v38, 3 }
  0xc2   :  { %v147_v3 = vsel %vm130_vm6, %v146_v63, 0.0  ;;  %v154_v4 = vrot.slane %v145_v62, 5  ;;  %v278_v41 = vsel %vm124_vm5, %v277_v57, %v269_v7  ;;  %v248_v38 = vsel %vm120_vm4, %v247_v51, %v2274_v43 }
  0xc3   :  { %v2315_v8 = vsel %vm114_vm0, %v147_v3, 0.0  ;;  %v182_v63 = vsel %vm120_vm4, %v181_v52, %v2255_v32  ;;  %v261_v6 = vsel %vm116_vm1, %v260_v59, %v253_v56  ;;  %v358_v59 = vld [vmem:[%s2942_s1] sm:$0xff] }
  0xc4   :  { %v2322_v13 = vsel %vm116_vm1, %v153_v36, %v154_v4  ;;  %v156_v14 = vrot.slane %v2315_v8, 5  ;;  %v206_v36 = vrot.slane %v2274_v43, 3  ;;  %v262_v11 = vsel %vm118_vm2, %v261_v6, %v2274_v43  ;;  %v362_v8 = vld [vmem:[%s2942_s1 + $0x20] sm:$0xf] }
  0xc5   :  { %v176_v17 = vrot.slane %v2322_v13, 3  ;;  %v191_v18 = vrot.slane %v2322_v13, 4  ;;  %v208_v19 = vrot.slane %v2322_v13, 5  ;;  %v286_v24 = vrot.slane %v2322_v13, 6 }
  0xc6   :  { %v2334_v22 = vsel %vm116_vm1, %v154_v4, %v156_v14  ;;  %v234_v34 = vsel %vm130_vm6, %v233_v23, %v2322_v13  ;;  %v240_v50 = vrot.slane %v2322_v13, 1  ;;  %v214_v58 = vsel %vm120_vm4, %v213_v55, %v206_v36  ;;  %v359_v55 = vld [vmem:[%s2942_s1 + $0x8] sm:$0xff] }
  0xc7   :  { %v198_v27 = vsel %vm130_vm6, %v197_v0, %v176_v17  ;;  %v227_v28 = vrot.slane %v2334_v22, 1  ;;  %v275_v29 = vrot.slane %v2334_v22, 7  ;;  %v291_v30 = vsel %vm118_vm2, %v290_v26, %v208_v19 }
  0xc8   :  { %v199_v33 = vsel %vm114_vm0, %v198_v27, %v191_v18  ;;  %v292_v35 = vsel %vm120_vm4, %v291_v30, %v286_v24  ;;  %v174_v60 = vrot.slane %v2322_v13, 2  ;;  %v215_v61 = vsel %vm130_vm6, %v214_v58, %v191_v18 }
  0xc9   :  { %311 = vrot.lane.b32.xlu1 %v199_v33, %s2140_s0  ;;  %v235_v37 = vsel %vm114_vm0, %v234_v34, %v227_v28  ;;  %v293_v39 = vsel %vm130_vm6, %v292_v35, %v275_v29  ;;  %v242_v62 = vrot.slane %v2334_v22, 2  ;;  %v249_v25 = vsel %vm130_vm6, %v248_v38, %v240_v50 }
  0xca   :  { %319 = vrot.lane.b32.xlu2 %v235_v37, %s2141_s21  ;;  %v294_v48 = vsel %vm114_vm0, %v293_v39, %v2334_v22  ;;  %v183_v44 = vsel %vm130_vm6, %v182_v63, %v174_v60  ;;  %v279_v0 = vsel %vm116_vm1, %v278_v41, %v271_v54  ;;  %v216_v4 = vsel %vm114_vm0, %v215_v61, %v208_v19 }
  0xcb   :  { %335 = vrot.lane.b32.xlu0 %v294_v48, %s2142_s22  ;;  %v2394_v3 = vsel %vm114_vm0, %v183_v44, %v176_v17  ;;  %v280_v7 = vsel %vm118_vm2, %v279_v0, %v191_v18  ;;  %v250_v54 = vsel %vm114_vm0, %v249_v25, %v242_v62  ;;  %v273_v10 = vrot.slane %v2334_v22, 6 }
  0xcc   :  { %v281_v12 = vsel %vm120_vm4, %v280_v7, %v208_v19  ;;  %v257_v16 = vrot.slane %v2334_v22, 3  ;;  %v263_v17 = vsel %vm120_vm4, %v262_v11, %v255_v5  ;;  %v2413_v18 = vrot.slane %v2139_v31, 5 }
  0xcd   :  { %v264_v43 = vsel %vm130_vm6, %v263_v17, %v242_v62  ;;  %v282_v21 = vsel %vm130_vm6, %v281_v12, %v273_v10  ;;  %v299_v23 = vrot.slane %v2322_v13, 7  ;;  %v305_v26 = vsel %vm116_vm1, %v304_v15, %v297_v45 }
  0xce   :  { %v306_v19 = vsel %vm118_vm2, %v305_v26, %v286_v24  ;;  %v265_v42 = vsel %vm114_vm0, %v264_v43, %v257_v16  ;;  %v283_v27 = vsel %vm114_vm0, %v282_v21, %v275_v29  ;;  %v159_v28 = vsel %vm116_vm1, %v156_v14, %v2413_v18  ;;  %v361_v14 = vld [vmem:[%s2942_s1 + $0x18] sm:$0xff]  ;;  %v360_v29 = vld [vmem:[%s2942_s1 + $0x10] sm:$0xff] }
  0xcf   :  { %v307_v13 = vsel %vm120_vm4, %v306_v19, %v299_v23  ;;  %v301_v24 = vrot.slane %v159_v28, 1  ;;  %v372_v34 = vsel %vm118_vm2, %v362_v8, 0  ;;  %v389_v35 = vand.u32 4294901760, %v360_v29 }
  0xd0   :  { %v308_v30 = vsel %vm130_vm6, %v307_v13, %v2334_v22  ;;  %v387_v22 = vand.u32 4294901760, %v361_v14  ;;  %v385_v36 = vand.u32 4294901760, %v372_v34  ;;  %v391_v58 = vand.u32 4294901760, %v359_v55 }
  0xd1   :  { %315 = vrot.lane.b32.xlu1 %v216_v4, %s2143_s23  ;;  %v309_v33 = vsel %vm114_vm0, %v308_v30, %v301_v24  ;;  %v428_v39 = vsub.f32 %v360_v29, %v389_v35  ;;  %v393_v61 = vand.u32 4294901760, %v358_v59  ;;  %v2132_v24 = vld [vmem:[%s2943_s2] ss:$0 sm:$0xff] }
  0xd2   :  { %323 = vrot.lane.b32.xlu2 %v250_v54, %s2144_s24  ;;  %v422_v37 = vsub.f32 %v361_v14, %v387_v22  ;;  %v416_v40 = vsub.f32 %v372_v34, %v385_v36  ;;  %494 = vmatpush.msra.mxu3 %v385_v36  ;;  %v434_v60 = vsub.f32 %v359_v55, %v391_v58 }
  0xd3   :  { %386 = vmatpush.msra.mxu0 %v385_v36  ;;  %v429_v48 = vand.u32 4294901760, %v428_v39  ;;  %v440_v25 = vsub.f32 %v358_v59, %v393_v61 }
  0xd4   :  { %v423_v46 = vand.u32 4294901760, %v422_v37  ;;  %v417_v50 = vand.u32 4294901760, %v416_v40  ;;  %463 = vmatpush.msra.mxu2 %v416_v40  ;;  %496 = vmatpush.msra.mxu3 %v387_v22  ;;  %v435_v63 = vand.u32 4294901760, %v434_v60 }
  0xd5   :  { %388 = vmatpush.msra.mxu0 %v387_v22  ;;  %v430_v53 = vsub.f32 %v428_v39, %v429_v48  ;;  %v441_v0 = vand.u32 4294901760, %v440_v25 }
  0xd6   :  { %v424_v51 = vsub.f32 %v422_v37, %v423_v46  ;;  %v418_v52 = vsub.f32 %v416_v40, %v417_v50  ;;  %466 = vmatpush.msra.mxu2 %v422_v37  ;;  %498 = vmatpush.msra.mxu3 %v389_v35  ;;  %v436_v44 = vsub.f32 %v434_v60, %v435_v63 }
  0xd7   :  { %390 = vmatpush.msra.mxu0 %v389_v35  ;;  %v431_v41 = vand.u32 4294901760, %v430_v53  ;;  %v442_v4 = vsub.f32 %v440_v25, %v441_v0 }
  0xd8   :  { %v419_v56 = vand.u32 4294901760, %v418_v52  ;;  %v425_v57 = vand.u32 4294901760, %v424_v51  ;;  %469 = vmatpush.msra.mxu2 %v428_v39  ;;  %500 = vmatpush.msra.mxu3 %v391_v58  ;;  %v437_v1 = vand.u32 4294901760, %v436_v44 }
  0xd9   :  { %327 = vrot.lane.b32.xlu1 %v265_v42, %s2145_s25  ;;  %392 = vmatpush.msra.mxu0 %v391_v58  ;;  %v443_v5 = vand.u32 4294901760, %v442_v4 }
  0xda   :  { %331 = vrot.lane.b32.xlu2 %v283_v27, %s2146_s26  ;;  %420 = vmatpush.msra.mxu1 %v419_v56 }
  0xdb   :  { %472 = vmatpush.msra.mxu2 %v434_v60  ;;  %502 = vmatpush.msra.mxu3 %v393_v61 }
  0xdc   :  { %426 = vmatpush.msra.mxu1 %v425_v57  ;;  %394 = vmatpush.msra.mxu0 %v393_v61 }
  0xdd   :  { %475 = vmatpush.msra.mxu2 %v440_v25 }
  0xde   :  { %432 = vmatpush.msra.mxu1 %v431_v41  ;;  %524 = vmatpush.msrb.mxu0 %v417_v50 }
  0xe0   :  { %528 = vmatpush.msrb.mxu0 %v423_v46  ;;  %438 = vmatpush.msra.mxu1 %v437_v1 }
  0xe1   :  { %339 = vrot.lane.b32.xlu1 %v309_v33, %s2147_s27 }
  0xe2   :  { %532 = vmatpush.msrb.mxu0 %v429_v48  ;;  %444 = vmatpush.msra.mxu1 %v443_v5 }
  0xe4   :  { %558 = vmatpush.msrb.mxu1 %v385_v36  ;;  %536 = vmatpush.msrb.mxu0 %v435_v63 }
  0xe6   :  { %560 = vmatpush.msrb.mxu1 %v387_v22  ;;  %540 = vmatpush.msrb.mxu0 %v441_v0 }
  0xe8   :  { %562 = vmatpush.msrb.mxu1 %v389_v35 }
  0xea   :  { %564 = vmatpush.msrb.mxu1 %v391_v58 }
  0xec   :  { %566 = vmatpush.msrb.mxu1 %v393_v61 }
 0x124   :  { %v320_v62 = vpop.permute.xlu2 %319 }
 0x12c   :  { %v324_v7 = vpop.permute.xlu2 %323 }
 0x134   :  { %v332_v16 = vpop.permute.xlu2 %331 }
 0x13b   :  { %v312_v38 = vpop.permute.xlu1 %311 }
 0x13c   :  { %v343_v54 = vsel %vm342_vm7, %v2394_v3, %v312_v38 }
 0x13d   :  { %v336_v17 = vpop.permute.xlu0 %335 }
 0x143   :  { %v316_v6 = vpop.permute.xlu1 %315 }
 0x144   :  { %v345_v11 = vsel %vm344_vm8, %v343_v54, %v316_v6 }
 0x145   :  { %v347_v45 = vsel %vm346_vm9, %v345_v11, %v320_v62 }
 0x146   :  { %v349_v12 = vsel %vm348_vm10, %v347_v45, %v324_v7 }
 0x14b   :  { %v328_v10 = vpop.permute.xlu1 %327 }
 0x14c   :  { %v351_v15 = vsel %vm350_vm11, %v349_v12, %v328_v10 }
 0x14d   :  { %v353_v3 = vsel %vm352_vm12, %v351_v15, %v332_v16 }
 0x14e   :  { %v355_v21 = vsel %vm354_vm13, %v353_v3, %v336_v17 }
 0x153   :  { %v340_v43 = vpop.permute.xlu1 %339 }
 0x154   :  { %v357_v23 = vsel %vm356_vm14, %v355_v21, %v340_v43 }
 0x155   :  { %v369_v26 = vsel %vm367_vm15, %v357_v23, 0 }
 0x156   :  { %v395_v19 = vand.u32 4294901760, %v369_v26 }
 0x158   :  { %v396_v42 = vsub.f32 %v369_v26, %v395_v19  ;;  %446 = vmatmul.f32.vlgmr.msra.gmra.mxu1 %v395_v19 }
 0x15a   :  { %478 = vmatmul.f32.vlgmr.msra.gmra.mxu2 %v396_v42  ;;  %v397_v27 = vand.u32 4294901760, %v396_v42 }
 0x15c   :  { %506 = vmatmul.f32.vlgmr.msra.gmra.mxu3 %v397_v27  ;;  %v398_v28 = vsub.f32 %v396_v42, %v397_v27  ;;  %v676_v42 = vld [vmem:[%s2944_s3 + $0x18] sm:$0xff]  ;;  %v675_v27 = vld [vmem:[%s2944_s3 + $0x10] sm:$0xff] }
 0x15e   :  { %v399_v13 = vand.u32 4294901760, %v398_v28 }
 0x160   :  { %400 = vmatmul.f32.vlgmr.msra.gmra.mxu0 %v399_v13  ;;  %568 = vmatmul.f32.vlgmr.msrb.gmra.mxu1 %v395_v19  ;;  %v701_v13 = vand.u32 4294901760, %v676_v42 }
 0x168   :  { %542 = vmatmul.f32.vlgmr.msrb.gmra.mxu0 %v395_v19  ;;  %v677_v19 = vld [vmem:[%s2944_s3 + $0x20] sm:$0xf] }
 0x169   :  { %v686_v28 = vsel %vm118_vm2, %v677_v19, 0  ;;  %v1108_v19 = vsel %vm124_vm5, 0.0, %v2280_v47 }
 0x1d5   :  { %v447_v30 = vpop.f32.mrf.mxu1 }
 0x1dd   :  { %v401_v33 = vpop.f32.mrf.mxu0  ;;  %v479_v29 = vpop.f32.mrf.mxu2 }
 0x1de   :  { %v402_v8 = vadd.f32 %v2132_v24, %v401_v33  ;;  %v569_v39 = vpop.f32.mrf.mxu1  ;;  %v703_v24 = vand.u32 4294901760, %v675_v27  ;;  %v736_v33 = vsub.f32 %v676_v42, %v701_v13  ;;  %v887_v42 = vld [vmem:[%s2946_s5] sm:$0xf] }
 0x1df   :  { %v507_v22 = vpop.f32.mrf.mxu3 }
 0x1e0   :  { %v448_v14 = vadd.f32 %v447_v30, %v402_v8  ;;  %v699_v30 = vand.u32 4294901760, %v686_v28  ;;  %v742_v8 = vsub.f32 %v675_v27, %v703_v24  ;;  %v896_v27 = vsel %vm118_vm2, %v887_v42, 0 }
 0x1e2   :  { %v480_v34 = vadd.f32 %v479_v29, %v448_v14  ;;  %v730_v14 = vsub.f32 %v686_v28, %v699_v30  ;;  %808 = vmatpush.msra.mxu1 %v699_v30  ;;  %700 = vmatpush.msrb.mxu2 %v699_v30  ;;  %v737_v29 = vand.u32 4294901760, %v736_v33 }
 0x1e4   :  { %v508_v35 = vadd.f32 %v507_v22, %v480_v34  ;;  %v743_v34 = vand.u32 4294901760, %v742_v8  ;;  %v731_v22 = vand.u32 4294901760, %v730_v14  ;;  %777 = vmatpush.msra.mxu0 %v730_v14  ;;  %810 = vmatpush.msra.mxu1 %v701_v13 }
 0x1e5   :  { %v543_v36 = vpop.f32.mrf.mxu0  ;;  %702 = vmatpush.msrb.mxu2 %v701_v13 }
 0x1e6   :  { %v544_v37 = vadd.f32 %v543_v36, %v508_v35  ;;  %v738_v35 = vsub.f32 %v736_v33, %v737_v29  ;;  %780 = vmatpush.msra.mxu0 %v736_v33  ;;  %812 = vmatpush.msra.mxu1 %v703_v24 }
 0x1e7   :  { %704 = vmatpush.msrb.mxu2 %v703_v24 }
 0x1e8   :  { %v570_v40 = vadd.f32 %v569_v39, %v544_v37  ;;  %v732_v37 = vsub.f32 %v730_v14, %v731_v22  ;;  %v744_v39 = vsub.f32 %v742_v8, %v743_v34  ;;  %783 = vmatpush.msra.mxu0 %v742_v8 }
 0x1ea   :  { %v2466_v46 = vmax.f32 %v570_v40, 0.0  ;;  %v733_v40 = vand.u32 4294901760, %v732_v37 }
 0x1ec   :  { %v574_v48 = vrot.slane %v2466_v46, 3  ;;  %v578_v50 = vrot.slane %v2466_v46, 7  ;;  %v580_v59 = vrot.slane %v2466_v46, 5  ;;  %v576_v1 = vrot.slane %v2466_v46, 1  ;;  %734 = vmatpush.msrb.mxu3 %v733_v40 }
 0x1ee   :  { %v582_v51 = vsel %vm120_vm4, 0.0, %v574_v48  ;;  %v587_v52 = vsel %vm120_vm4, 0.0, %v578_v50  ;;  %v589_v38 = vsel %vm122_vm3, 0.0, %v580_v59  ;;  %v584_v7 = vsel %vm122_vm3, 0.0, %v576_v1  ;;  %v674_v50 = vld [vmem:[%s2944_s3 + $0x8] sm:$0xff] }
 0x1ef   :  { %v583_v53 = vsel %vm114_vm0, %v582_v51, 0.0  ;;  %v588_v55 = vsel %vm114_vm0, %v587_v52, 0.0  ;;  %v590_v4 = vsel %vm116_vm1, %v589_v38, 0.0  ;;  %v585_v11 = vsel %vm116_vm1, %v584_v7, 0.0 }
 0x1f0   :  { %v600_v56 = vrot.slane %v583_v53, 2  ;;  %v602_v57 = vrot.slane %v588_v55, 1  ;;  %v597_v58 = vrot.slane %v583_v53, 1  ;;  %v593_v61 = vrot.slane %v588_v55, 7 }
 0x1f1   :  { %v610_v62 = vrot.slane %v583_v53, 5  ;;  %v612_v63 = vrot.slane %v588_v55, 4  ;;  %v605_v25 = vrot.slane %v583_v53, 4  ;;  %v607_v44 = vrot.slane %v588_v55, 3 }
 0x1f2   :  { %v604_v41 = vsel %vm122_vm3, %v600_v56, %v602_v57  ;;  %v599_v60 = vsel %vm122_vm3, %v597_v58, %v588_v55  ;;  %v2481_v0 = vsel %vm122_vm3, %v583_v53, %v593_v61  ;;  %v591_v54 = vsel %vm118_vm2, %v590_v4, 0.0 }
 0x1f3   :  { %638 = vrot.lane.b32.xlu1 %v604_v41, %s2143_s23  ;;  %634 = vrot.lane.b32.xlu2 %v599_v60, %s2140_s0  ;;  %v614_v5 = vsel %vm122_vm3, %v610_v62, %v612_v63  ;;  %v609_v6 = vsel %vm122_vm3, %v605_v25, %v607_v44  ;;  %v621_v45 = vrot.slane %v591_v54, 7  ;;  %v615_v10 = vrot.slane %v583_v53, 6  ;;  %v673_v53 = vld [vmem:[%s2944_s3] sm:$0xff] }
 0x1f4   :  { %v617_v12 = vrot.slane %v588_v55, 5  ;;  %v586_v15 = vsel %vm118_vm2, %v585_v11, 0.0  ;;  %v630_v43 = vrot.slane %v591_v54, 1  ;;  %v739_v48 = vand.u32 4294901760, %v738_v35 }
 0x1f5   :  { %v623_v16 = vsel %vm122_vm3, %v586_v15, %v621_v45  ;;  %v628_v17 = vrot.slane %v586_v15, 2  ;;  %v625_v21 = vrot.slane %v586_v15, 1  ;;  %v705_v51 = vand.u32 4294901760, %v674_v50 }
 0x1f6   :  { %v619_v3 = vsel %vm122_vm3, %v615_v10, %v617_v12  ;;  %v745_v52 = vand.u32 4294901760, %v744_v39  ;;  %v707_v56 = vand.u32 4294901760, %v673_v53  ;;  %740 = vmatpush.msrb.mxu3 %v739_v48 }
 0x1f7   :  { %v632_v23 = vsel %vm122_vm3, %v628_v17, %v630_v43  ;;  %v627_v26 = vsel %vm122_vm3, %v625_v21, %v591_v54  ;;  %v748_v55 = vsub.f32 %v674_v50, %v705_v51  ;;  %814 = vmatpush.msra.mxu1 %v705_v51  ;;  %706 = vmatpush.msrb.mxu2 %v705_v51 }
 0x1f8   :  { %v754_v59 = vsub.f32 %v673_v53, %v707_v56  ;;  %746 = vmatpush.msrb.mxu3 %v745_v52 }
 0x1f9   :  { %v749_v58 = vand.u32 4294901760, %v748_v55  ;;  %786 = vmatpush.msra.mxu0 %v748_v55  ;;  %816 = vmatpush.msra.mxu1 %v707_v56 }
 0x1fa   :  { %708 = vmatpush.msrb.mxu2 %v707_v56  ;;  %v755_v60 = vand.u32 4294901760, %v754_v59 }
 0x1fb   :  { %646 = vrot.lane.b32.xlu1 %v614_v5, %s2144_s24  ;;  %642 = vrot.lane.b32.xlu2 %v609_v6, %s2141_s21  ;;  %v750_v41 = vsub.f32 %v748_v55, %v749_v58 }
 0x1fc   :  { %789 = vmatpush.msra.mxu0 %v754_v59  ;;  %838 = vmatpush.msra.mxu2 %v731_v22  ;;  %v756_v38 = vsub.f32 %v754_v59, %v755_v60 }
 0x1fd   :  { %v751_v62 = vand.u32 4294901760, %v750_v41 }
 0x1fe   :  { %842 = vmatpush.msra.mxu2 %v737_v29  ;;  %v757_v63 = vand.u32 4294901760, %v756_v38  ;;  %v2133_v29 = vld [vmem:[%s2945_s4] ss:$0 sm:$0xff] }
 0x1ff   :  { %752 = vmatpush.msrb.mxu3 %v751_v62 }
 0x200   :  { %846 = vmatpush.msra.mxu2 %v743_v34 }
 0x201   :  { %758 = vmatpush.msrb.mxu3 %v757_v63 }
 0x202   :  { %850 = vmatpush.msra.mxu2 %v749_v58 }
 0x203   :  { %654 = vrot.lane.b32.xlu1 %v623_v16, %s2146_s26  ;;  %650 = vrot.lane.b32.xlu2 %v619_v3, %s2145_s25 }
 0x204   :  { %872 = vmatpush.msra.mxu3 %v699_v30  ;;  %854 = vmatpush.msra.mxu2 %v755_v60 }
 0x206   :  { %874 = vmatpush.msra.mxu3 %v701_v13  ;;  %v913_v13 = vand.u32 4294901760, %v896_v27 }
 0x208   :  { %876 = vmatpush.msra.mxu3 %v703_v24  ;;  %v940_v30 = vsub.f32 %v896_v27, %v913_v13  ;;  %914 = vmatpush.msrb.mxu0 %v913_v13 }
 0x20a   :  { %878 = vmatpush.msra.mxu3 %v705_v51  ;;  %v941_v33 = vand.u32 4294901760, %v940_v30 }
 0x20b   :  { %662 = vrot.lane.b32.xlu1 %v632_v23, %s2147_s27  ;;  %658 = vrot.lane.b32.xlu2 %v627_v26, %s2142_s22  ;;  %v2528_v23 = vrot.slane %v2139_v31, 6  ;;  %v2531_v26 = vrot.slane %v2139_v31, 4 }
 0x20c   :  { %880 = vmatpush.msra.mxu3 %v707_v56  ;;  %v942_v8 = vsub.f32 %v940_v30, %v941_v33 }
 0x20d   :  { %v1109_v28 = vsel %vm118_vm2, %v1108_v19, %v2531_v26 }
 0x20e   :  { %v1110_v24 = vsel %vm130_vm6, %v1109_v28, %v2528_v23  ;;  %v943_v14 = vand.u32 4294901760, %v942_v8 }
 0x210   :  { %944 = vmatpush.msrb.mxu1 %v943_v14 }
 0x213   :  { %1139 = vrot.lane.b32.xlu1 %v1110_v24, %s2146_s26  ;;  %v2568_v24 = vrot.slane %v2139_v31, 3 }
 0x24d   :  { %v635_v36 = vpop.permute.xlu2 %634 }
 0x24e   :  { %v665_v44 = vsel %vm342_vm7, %v2481_v0, %v635_v36 }
 0x255   :  { %v643_v61 = vpop.permute.xlu2 %642 }
 0x25d   :  { %v651_v1 = vpop.permute.xlu2 %650 }
 0x265   :  { %v639_v57 = vpop.permute.xlu1 %638  ;;  %v659_v45 = vpop.permute.xlu2 %658 }
 0x266   :  { %v666_v4 = vsel %vm344_vm8, %v665_v44, %v639_v57 }
 0x267   :  { %v667_v5 = vsel %vm346_vm9, %v666_v4, %v643_v61 }
 0x26d   :  { %v647_v25 = vpop.permute.xlu1 %646 }
 0x26e   :  { %v668_v7 = vsel %vm348_vm10, %v667_v5, %v647_v25 }
 0x26f   :  { %v669_v54 = vsel %vm350_vm11, %v668_v7, %v651_v1 }
 0x275   :  { %v655_v6 = vpop.permute.xlu1 %654 }
 0x276   :  { %v670_v11 = vsel %vm352_vm12, %v669_v54, %v655_v6 }
 0x277   :  { %v671_v12 = vsel %vm354_vm13, %v670_v11, %v659_v45  ;;  %v1090_v11 = vrot.slane %v2139_v31, 7  ;;  %v1115_v31 = vsel %vm124_vm5, %v2280_v47, %v2531_v26 }
 0x27d   :  { %v663_v10 = vpop.permute.xlu1 %662 }
 0x27e   :  { %v672_v0 = vsel %vm356_vm14, %v671_v12, %v663_v10 }
 0x27f   :  { %v683_v15 = vsel %vm367_vm15, %v672_v0, 0 }
 0x280   :  { %v709_v16 = vand.u32 4294901760, %v683_v15 }
 0x282   :  { %v710_v3 = vsub.f32 %v683_v15, %v709_v16  ;;  %760 = vmatmul.f32.vlgmr.msrb.gmra.mxu3 %v709_v16 }
 0x283   :  { %990 = vmatpush.msrb.mxu3 %v913_v13 }
 0x284   :  { %792 = vmatmul.f32.vlgmr.msra.gmra.mxu0 %v710_v3  ;;  %v711_v17 = vand.u32 4294901760, %v710_v3 }
 0x285   :  { %1016 = vmatpush.msra.mxu0 %v941_v33 }
 0x286   :  { %820 = vmatmul.f32.vlgmr.msra.gmra.mxu1 %v711_v17  ;;  %v712_v43 = vsub.f32 %v710_v3, %v711_v17 }
 0x287   :  { %1038 = vmatpush.msra.mxu1 %v913_v13 }
 0x288   :  { %v713_v21 = vand.u32 4294901760, %v712_v43 }
 0x28a   :  { %714 = vmatmul.f32.vlgmr.msrb.gmra.mxu2 %v713_v21  ;;  %882 = vmatmul.f32.vlgmr.msra.gmra.mxu3 %v709_v16 }
 0x28b   :  { %967 = vmatpush.msrb.mxu2 %v940_v30 }
 0x292   :  { %856 = vmatmul.f32.vlgmr.msra.gmra.mxu2 %v709_v16 }
 0x301   :  { %v793_v37 = vpop.f32.mrf.mxu0 }
 0x303   :  { %v821_v40 = vpop.f32.mrf.mxu1 }
 0x305   :  { %v761_v34 = vpop.f32.mrf.mxu3 }
 0x30d   :  { %v715_v22 = vpop.f32.mrf.mxu2  ;;  %v883_v52 = vpop.f32.mrf.mxu3 }
 0x30e   :  { %v716_v35 = vadd.f32 %v2133_v29, %v715_v22 }
 0x310   :  { %v762_v36 = vadd.f32 %v761_v34, %v716_v35  ;;  %v1116_v35 = vsel %vm118_vm2, %v1115_v31, %v2528_v23 }
 0x312   :  { %v794_v39 = vadd.f32 %v793_v37, %v762_v36  ;;  %v1117_v37 = vsel %vm130_vm6, %v1116_v35, 0.0 }
 0x314   :  { %v822_v48 = vadd.f32 %v821_v40, %v794_v39  ;;  %v1112_v40 = vsel %vm124_vm5, %v2255_v32, %v2568_v24 }
 0x315   :  { %v857_v50 = vpop.f32.mrf.mxu2 }
 0x316   :  { %v858_v51 = vadd.f32 %v857_v50, %v822_v48  ;;  %v1113_v48 = vsel %vm118_vm2, %v1112_v40, %v2413_v18 }
 0x317   :  { %v1114_v50 = vsel %vm130_vm6, %v1113_v48, %v1090_v11 }
 0x318   :  { %v884_v53 = vadd.f32 %v883_v52, %v858_v51  ;;  %v1162_v51 = vld [vmem:[%s2948_s7 + $0x20] sm:$0xf] }
 0x319   :  { %v1171_v52 = vsel %vm118_vm2, %v1162_v51, 0  ;;  %v2134_v51 = vld [vmem:[%s2947_s6] ss:$0 sm:$0xff] }
 0x31a   :  { %v886_v55 = vmax.f32 %v884_v53, 0.0  ;;  %v1184_v53 = vand.u32 4294901760, %v1171_v52 }
 0x31c   :  { %v893_v56 = vsel %vm342_vm7, %v886_v55, 0  ;;  %v1048_v57 = vrot.slane %v886_v55, 3  ;;  %v1050_v58 = vrot.slane %v886_v55, 4  ;;  %v1215_v55 = vsub.f32 %v1171_v52, %v1184_v53  ;;  %1185 = vmatpush.msra.mxu2 %v1184_v53 }
 0x31d   :  { %v915_v59 = vand.u32 4294901760, %v893_v56 }
 0x31e   :  { %v1052_v41 = vsel %vm120_vm4, 0.0, %v1048_v57  ;;  %v1054_v60 = vsel %vm120_vm4, 0.0, %v1050_v58  ;;  %v1216_v58 = vand.u32 4294901760, %v1215_v55 }
 0x31f   :  { %v1053_v61 = vsel %vm130_vm6, %v1052_v41, 0.0  ;;  %v1055_v62 = vsel %vm130_vm6, %v1054_v60, 0.0  ;;  %946 = vmatmul.f32.vlgmr.msrb.gmra.mxu1 %v915_v59  ;;  %v916_v38 = vsub.f32 %v893_v56, %v915_v59  ;;  %v1161_v56 = vld [vmem:[%s2948_s7 + $0x18] sm:$0xff] }
 0x320   :  { %v1067_v63 = vrot.slane %v1053_v61, 1  ;;  %v1069_v25 = vrot.slane %v1053_v61, 3  ;;  %v1071_v44 = vrot.slane %v1055_v62, 5  ;;  %v1057_v4 = vrot.slane %v1053_v61, 2  ;;  %1293 = vmatpush.msrb.mxu1 %v1184_v53 }
 0x321   :  { %970 = vmatmul.f32.vlgmr.msrb.gmra.mxu2 %v916_v38  ;;  %v917_v1 = vand.u32 4294901760, %v916_v38  ;;  %v1062_v5 = vrot.slane %v1055_v62, 6  ;;  %v1078_v6 = vrot.slane %v1053_v61, 4  ;;  %v1073_v7 = vrot.slane %v1055_v62, 7 }
 0x322   :  { %v1075_v54 = vsel %vm124_vm5, %v1067_v63, %v1069_v25  ;;  %v1088_v0 = vrot.slane %v1053_v61, 5  ;;  %v1092_v21 = vrot.slane %v1055_v62, 1  ;;  %v1060_v19 = vrot.slane %v1055_v62, 4 }
 0x323   :  { %994 = vmatmul.f32.vlgmr.msrb.gmra.mxu3 %v917_v1  ;;  %v1076_v45 = vsel %vm118_vm2, %v1075_v54, %v1071_v44  ;;  %v1080_v10 = vsel %vm124_vm5, %v1057_v4, %v1078_v6  ;;  %v918_v12 = vsub.f32 %v916_v38, %v917_v1  ;;  %v1085_v43 = vsel %vm124_vm5, %v1078_v6, %v2528_v23  ;;  %v1159_v38 = vld [vmem:[%s2948_s7 + $0x8] sm:$0xff] }
 0x324   :  { %v1077_v15 = vsel %vm130_vm6, %v1076_v45, %v1073_v7  ;;  %v1081_v16 = vsel %vm118_vm2, %v1080_v10, %v1062_v5  ;;  %v1096_v42 = vsel %vm124_vm5, %v1088_v0, %v1090_v11  ;;  %v1064_v27 = vsel %vm124_vm5, %v1053_v61, %v1057_v4  ;;  %v1158_v4 = vld [vmem:[%s2948_s7] sm:$0xff]  ;;  %v1140_v11 = vpop.permute.xlu1 %1139 }
 0x325   :  { %1119 = vrot.lane.b32.xlu2 %v1077_v15, %s2140_s0  ;;  %v1082_v3 = vsel %vm130_vm6, %v1081_v16, %v1055_v62  ;;  %v919_v17 = vand.u32 4294901760, %v918_v12  ;;  %v1065_v28 = vsel %vm118_vm2, %v1064_v27, %v1060_v19  ;;  %v1086_v13 = vsel %vm118_vm2, %v1085_v43, %v1055_v62 }
 0x326   :  { %1123 = vrot.lane.b32.xlu1 %v1082_v3, %s2143_s23  ;;  %v2571_v30 = vsel %vm130_vm6, %v1065_v28, %v1062_v5  ;;  %v1097_v33 = vsel %vm118_vm2, %v1096_v42, %v1092_v21  ;;  %v1099_v8 = vrot.slane %v1053_v61, 6  ;;  %v1087_v14 = vsel %vm130_vm6, %v1086_v13, %v2280_v47 }
 0x327   :  { %920 = vmatmul.f32.vlgmr.msrb.gmra.mxu0 %v919_v17  ;;  %1040 = vmatmul.f32.vlgmr.msra.gmra.mxu1 %v915_v59  ;;  %v1098_v29 = vsel %vm130_vm6, %v1097_v33, %v2568_v24  ;;  %v1101_v34 = vrot.slane %v1055_v62, 2  ;;  %v1186_v57 = vand.u32 4294901760, %v1161_v56  ;;  %v1217_v62 = vsub.f32 %v1215_v55, %v1216_v58 }
 0x328   :  { %v1105_v22 = vsel %vm124_vm5, %v1099_v8, 0.0  ;;  %1262 = vmatpush.msrb.mxu0 %v1215_v55  ;;  %v1190_v44 = vand.u32 4294901760, %v1159_v38  ;;  %v1192_v54 = vand.u32 4294901760, %v1158_v4 }
 0x329   :  { %v1106_v36 = vsel %vm118_vm2, %v1105_v22, %v1101_v34  ;;  %v1221_v60 = vsub.f32 %v1161_v56, %v1186_v57  ;;  %1295 = vmatpush.msrb.mxu1 %v1186_v57  ;;  %1187 = vmatpush.msra.mxu2 %v1186_v57  ;;  %v1218_v1 = vand.u32 4294901760, %v1217_v62 }
 0x32a   :  { %v1107_v39 = vsel %vm130_vm6, %v1106_v36, %v2531_v26  ;;  %v1233_v7 = vsub.f32 %v1159_v38, %v1190_v44  ;;  %v1239_v0 = vsub.f32 %v1158_v4, %v1192_v54 }
 0x32b   :  { %v1222_v63 = vand.u32 4294901760, %v1221_v60  ;;  %1265 = vmatpush.msrb.mxu0 %v1221_v60  ;;  %1219 = vmatpush.msra.mxu3 %v1218_v1 }
 0x32c   :  { %v1234_v12 = vand.u32 4294901760, %v1233_v7  ;;  %v1240_v3 = vand.u32 4294901760, %v1239_v0 }
 0x32d   :  { %1127 = vrot.lane.b32.xlu2 %v1087_v14, %s2141_s21  ;;  %v1223_v5 = vsub.f32 %v1221_v60, %v1222_v63 }
 0x32e   :  { %1131 = vrot.lane.b32.xlu1 %v1098_v29, %s2144_s24  ;;  %v1235_v16 = vsub.f32 %v1233_v7, %v1234_v12  ;;  %v1241_v21 = vsub.f32 %v1239_v0, %v1240_v3 }
 0x32f   :  { %1018 = vmatmul.f32.vlgmr.msra.gmra.mxu0 %v915_v59  ;;  %v1160_v59 = vld [vmem:[%s2948_s7 + $0x10] sm:$0xff]  ;;  %v1224_v45 = vand.u32 4294901760, %v1223_v5 }
 0x330   :  { %v1188_v61 = vand.u32 4294901760, %v1160_v59  ;;  %v1236_v43 = vand.u32 4294901760, %v1235_v16  ;;  %v1242_v19 = vand.u32 4294901760, %v1241_v21 }
 0x331   :  { %1225 = vmatpush.msra.mxu3 %v1224_v45 }
 0x332   :  { %v1227_v25 = vsub.f32 %v1160_v59, %v1188_v61  ;;  %1297 = vmatpush.msrb.mxu1 %v1188_v61  ;;  %1189 = vmatpush.msra.mxu2 %v1188_v61 }
 0x334   :  { %v1228_v6 = vand.u32 4294901760, %v1227_v25  ;;  %1268 = vmatpush.msrb.mxu0 %v1227_v25  ;;  %1299 = vmatpush.msrb.mxu1 %v1190_v44 }
 0x335   :  { %1135 = vrot.lane.b32.xlu2 %v1107_v39, %s2145_s25  ;;  %1191 = vmatpush.msra.mxu2 %v1190_v44 }
 0x336   :  { %1147 = vrot.lane.b32.xlu1 %v1117_v37, %s2147_s27  ;;  %v1229_v10 = vsub.f32 %v1227_v25, %v1228_v6  ;;  %1271 = vmatpush.msrb.mxu0 %v1233_v7 }
 0x337   :  { %1301 = vmatpush.msrb.mxu1 %v1192_v54  ;;  %1193 = vmatpush.msra.mxu2 %v1192_v54 }
 0x338   :  { %v1230_v15 = vand.u32 4294901760, %v1229_v10  ;;  %1274 = vmatpush.msrb.mxu0 %v1239_v0 }
 0x339   :  { %1323 = vmatpush.msrb.mxu2 %v1216_v58 }
 0x33a   :  { %1231 = vmatpush.msra.mxu3 %v1230_v15 }
 0x33b   :  { %1327 = vmatpush.msrb.mxu2 %v1222_v63 }
 0x33c   :  { %1237 = vmatpush.msra.mxu3 %v1236_v43 }
 0x33d   :  { %1143 = vrot.lane.b32.xlu2 %v1114_v50, %s2142_s22  ;;  %1331 = vmatpush.msrb.mxu2 %v1228_v6 }
 0x33e   :  { %1243 = vmatpush.msra.mxu3 %v1242_v19 }
 0x33f   :  { %1335 = vmatpush.msrb.mxu2 %v1234_v12 }
 0x340   :  { %1357 = vmatpush.msrb.mxu3 %v1184_v53 }
 0x341   :  { %1339 = vmatpush.msrb.mxu2 %v1240_v3 }
 0x342   :  { %1359 = vmatpush.msrb.mxu3 %v1186_v57 }
 0x344   :  { %1361 = vmatpush.msrb.mxu3 %v1188_v61 }
 0x346   :  { %1363 = vmatpush.msrb.mxu3 %v1190_v44  ;;  %v2135_v44 = vld [vmem:[%s2949_s8] ss:$0 sm:$0xff] }
 0x348   :  { %1365 = vmatpush.msrb.mxu3 %v1192_v54 }
 0x37f   :  { %v1120_v41 = vpop.permute.xlu2 %1119 }
 0x380   :  { %v1150_v27 = vsel %vm342_vm7, %v2571_v30, %v1120_v41 }
 0x387   :  { %v1128_v17 = vpop.permute.xlu2 %1127 }
 0x38f   :  { %v1136_v28 = vpop.permute.xlu2 %1135 }
 0x397   :  { %v1144_v34 = vpop.permute.xlu2 %1143 }
 0x398   :  { %v1124_v42 = vpop.permute.xlu1 %1123 }
 0x399   :  { %v1151_v13 = vsel %vm344_vm8, %v1150_v27, %v1124_v42 }
 0x39a   :  { %v1152_v8 = vsel %vm346_vm9, %v1151_v13, %v1128_v17 }
 0x39c   :  { %v947_v55 = vpop.f32.mrf.mxu1 }
 0x3a0   :  { %v1132_v33 = vpop.permute.xlu1 %1131 }
 0x3a1   :  { %v1153_v14 = vsel %vm348_vm10, %v1152_v8, %v1132_v33 }
 0x3a2   :  { %v1154_v29 = vsel %vm350_vm11, %v1153_v14, %v1136_v28 }
 0x3a3   :  { %v1155_v31 = vsel %vm352_vm12, %v1154_v29, %v1140_v11 }
 0x3a4   :  { %v1156_v22 = vsel %vm354_vm13, %v1155_v31, %v1144_v34  ;;  %v921_v52 = vpop.f32.mrf.mxu0  ;;  %v971_v57 = vpop.f32.mrf.mxu2 }
 0x3a5   :  { %v922_v53 = vadd.f32 %v2134_v51, %v921_v52  ;;  %v1041_v62 = vpop.f32.mrf.mxu1 }
 0x3a6   :  { %v995_v59 = vpop.f32.mrf.mxu3 }
 0x3a7   :  { %v948_v56 = vadd.f32 %v947_v55, %v922_v53 }
 0x3a8   :  { %v1148_v35 = vpop.permute.xlu1 %1147 }
 0x3a9   :  { %v1157_v30 = vsel %vm356_vm14, %v1156_v22, %v1148_v35  ;;  %v972_v58 = vadd.f32 %v971_v57, %v948_v56 }
 0x3aa   :  { %v1168_v36 = vsel %vm367_vm15, %v1157_v30, 0 }
 0x3ab   :  { %v1194_v37 = vand.u32 4294901760, %v1168_v36  ;;  %v996_v41 = vadd.f32 %v995_v59, %v972_v58 }
 0x3ac   :  { %v1019_v60 = vpop.f32.mrf.mxu0 }
 0x3ad   :  { %v1195_v39 = vsub.f32 %v1168_v36, %v1194_v37  ;;  %1245 = vmatmul.f32.vlgmr.msra.gmra.mxu3 %v1194_v37  ;;  %v1020_v61 = vadd.f32 %v1019_v60, %v996_v41 }
 0x3af   :  { %1277 = vmatmul.f32.vlgmr.msrb.gmra.mxu0 %v1195_v39  ;;  %v1196_v40 = vand.u32 4294901760, %v1195_v39  ;;  %v1042_v38 = vadd.f32 %v1041_v62, %v1020_v61 }
 0x3b1   :  { %1305 = vmatmul.f32.vlgmr.msrb.gmra.mxu1 %v1196_v40  ;;  %v1197_v48 = vsub.f32 %v1195_v39, %v1196_v40  ;;  %v1044_v63 = vmul.f32 0.5, %v1042_v38 }
 0x3b3   :  { %v1198_v50 = vand.u32 4294901760, %v1197_v48  ;;  %2137 = vtanh.f32 %v1044_v63 }
 0x3b5   :  { %1199 = vmatmul.f32.vlgmr.msra.gmra.mxu2 %v1198_v50  ;;  %1367 = vmatmul.f32.vlgmr.msrb.gmra.mxu3 %v1194_v37 }
 0x3b9   :  { %v2138_v25 = vpop.eup %2137 }
 0x3ba   :  { %v1046_v1 = vadd.f32 1.0, %v2138_v25 }
 0x3bc   :  { %v1047_v7 = vmul.f32 0.5, %v1046_v1 }
 0x3bd   :  { %1341 = vmatmul.f32.vlgmr.msrb.gmra.mxu2 %v1194_v37 }
 0x3be   :  { %v2631_v10 = vperm.slane %v1047_v7, 0  ;;  %v2633_v12 = vperm.slane %v1047_v7, 1 }
 0x3c0   :  { %v1374_v43 = vsel %vm118_vm2, %v2631_v10, %v2633_v12 }
 0x3c1   :  { %v1375_v42 = vmul.f32 %v1374_v43, %v2466_v46 }
 0x42c   :  { %v1278_v11 = vpop.f32.mrf.mxu0 }
 0x42e   :  { %v1306_v0 = vpop.f32.mrf.mxu1 }
 0x430   :  { %v1246_v4 = vpop.f32.mrf.mxu3 }
 0x438   :  { %v1200_v5 = vpop.f32.mrf.mxu2  ;;  %v1368_v17 = vpop.f32.mrf.mxu3 }
 0x439   :  { %v1201_v6 = vadd.f32 %v2135_v44, %v1200_v5 }
 0x43b   :  { %v1247_v54 = vadd.f32 %v1246_v4, %v1201_v6 }
 0x43d   :  { %v1279_v45 = vadd.f32 %v1278_v11, %v1247_v54 }
 0x43f   :  { %v1307_v15 = vadd.f32 %v1306_v0, %v1279_v45 }
 0x440   :  { %v1342_v16 = vpop.f32.mrf.mxu2 }
 0x441   :  { %v1343_v3 = vadd.f32 %v1342_v16, %v1307_v15 }
 0x443   :  { %v1369_v21 = vadd.f32 %v1368_v17, %v1343_v3 }
 0x445   :  { %v1371_v19 = vmax.f32 %v1369_v21, 0.0 }
 0x447   :  { %v1376_v27 = vadd.f32 %v1375_v42, %v1371_v19 }
 0x449   :  { %v1380_v28 = vrot.slane %v1376_v27, 7  ;;  %v1378_v13 = vrot.slane %v1376_v27, 1  ;;  %v1385_v33 = vsel %vm122_vm3, 0.0, %v1376_v27  ;;  %v1382_v14 = vrot.slane %v1376_v27, 6 }
 0x44a   :  { %v1386_v8 = vsel %vm124_vm5, %v1385_v33, 0.0  ;;  %v1396_v22 = vrot.slane %v1376_v27, 2  ;;  %v1392_v41 = vrot.slane %v1376_v27, 4  ;;  %v1394_v38 = vrot.slane %v1376_v27, 3 }
 0x44b   :  { %v2642_v29 = vsel %vm114_vm0, 0.0, %v1378_v13  ;;  %v2645_v34 = vsel %vm118_vm2, %v1386_v8, 0.0  ;;  %v1388_v31 = vsel %vm116_vm1, 0.0, %v1380_v28 }
 0x44c   :  { %v1420_v35 = vrot.slane %v2642_v29, 2  ;;  %v1424_v46 = vrot.slane %v2645_v34, 4  ;;  %v1468_v30 = vrot.slane %v2645_v34, 6  ;;  %v1480_v36 = vrot.slane %v2642_v29, 6 }
 0x44d   :  { %v1389_v37 = vsel %vm118_vm2, %v1388_v31, 0.0  ;;  %v1497_v48 = vrot.slane %v2642_v29, 7  ;;  %v1498_v50 = vrot.slane %v2645_v34, 7  ;;  %v1402_v53 = vsel %vm118_vm2, 0.0, %v1396_v22 }
 0x44e   :  { %v1476_v39 = vsel %vm118_vm2, %v1420_v35, %v1424_v46  ;;  %v1390_v40 = vsel %vm120_vm4, %v1389_v37, %v1382_v14  ;;  %v1481_v51 = vsel %vm124_vm5, %v1480_v36, %v1468_v30  ;;  %v1501_v56 = vrot.slane %v2645_v34, 1 }
 0x44f   :  { %1577 = vrot.lane.b32.xlu2 %v1476_v39, %s2143_s23  ;;  %v2662_v52 = vsel %vm130_vm6, %v1390_v40, 0.0  ;;  %v1493_v55 = vsel %vm118_vm2, %v1481_v51, %v2645_v34  ;;  %v1442_v58 = vrot.slane %v2642_v29, 3  ;;  %v1443_v59 = vrot.slane %v2645_v34, 3 }
 0x450   :  { %v1502_v57 = vrot.slane %v2662_v52, 1  ;;  %1593 = vrot.lane.b32.xlu1 %v1493_v55, %s2141_s21  ;;  %v1499_v60 = vsel %vm122_vm3, %v1497_v48, %v1498_v50  ;;  %v1440_v62 = vrot.slane %v2642_v29, 1  ;;  %v1403_v63 = vsel %vm120_vm4, %v1402_v53, 0.0 }
 0x451   :  { %v1444_v44 = vsel %vm120_vm4, %v1442_v58, %v1443_v59  ;;  %v1427_v1 = vrot.slane %v2662_v52, 6  ;;  %v1447_v4 = vrot.slane %v2662_v52, 5  ;;  %v1398_v5 = vsel %vm122_vm3, %v1392_v41, 0.0 }
 0x452   :  { %v1503_v61 = vsel %vm114_vm0, %v1501_v56, %v1502_v57  ;;  %v1404_v6 = vsel %vm130_vm6, %v1403_v63, %v1378_v13  ;;  %v1463_v7 = vsel %vm118_vm2, %v1440_v62, %v1444_v44  ;;  %v1446_v54 = vrot.slane %v2645_v34, 5 }
 0x453   :  { %v1519_v25 = vsel %vm118_vm2, %v1499_v60, %v1503_v61  ;;  %v1399_v11 = vsel %vm124_vm5, %v1398_v5, %v1394_v38  ;;  %v1450_v45 = vrot.slane %v2662_v52, 7  ;;  %v1483_v0 = vrot.slane %v2662_v52, 2 }
 0x454   :  { %1609 = vrot.lane.b32.xlu0 %v1519_v25, %s2144_s24  ;;  %v1400_v15 = vsel %vm116_vm1, %v1399_v11, 0.0  ;;  %v2691_v16 = vsel %vm118_vm2, %v1424_v46, %v1427_v1  ;;  %v1448_v3 = vsel %vm116_vm1, %v1446_v54, %v1447_v4  ;;  %v1405_v17 = vsel %vm114_vm0, %v1404_v6, 0.0 }
 0x455   :  { %v1421_v43 = vrot.slane %v2645_v34, 2  ;;  %v1401_v21 = vsel %vm120_vm4, %v1400_v15, 0.0  ;;  %v1464_v19 = vsel %vm118_vm2, %v1448_v3, %v1450_v45  ;;  %v1409_v27 = vrot.slane %v1405_v17, 5 }
 0x456   :  { %v1469_v28 = vsel %vm124_vm5, %v1468_v30, %v1427_v1  ;;  %v1408_v13 = vrot.slane %v1401_v21, 5  ;;  %v1516_v30 = vrot.slane %v2413_v18, 1  ;;  %v1546_v59 = vrot.slane %v2413_v18, 5 }
 0x457   :  { %1561 = vrot.lane.b32.xlu2 %v1463_v7, %s2140_s0  ;;  %v1523_v42 = vsel %vm130_vm6, %v1421_v43, %v1483_v0  ;;  %v2710_v8 = vsel %vm116_vm1, %v1409_v27, %v2413_v18  ;;  %v1477_v14 = vsel %vm118_vm2, %v1469_v28, %v2662_v52  ;;  %v1422_v40 = vsel %vm130_vm6, %v1420_v35, %v1421_v43 }
 0x458   :  { %1641 = vrot.lane.b32.xlu1 %v2691_v16, %s2146_s26  ;;  %v1533_v33 = vsel %vm118_vm2, %v2645_v34, %v1523_v42  ;;  %v2716_v31 = vsel %vm116_vm1, %v1408_v13, %v1409_v27  ;;  %v2719_v22 = vsel %vm116_vm1, 0.0, %v1408_v13  ;;  %v1512_v46 = vrot.slane %v2710_v8, 7 }
 0x459   :  { %v1515_v34 = vrot.slane %v2710_v8, 1  ;;  %v1507_v36 = vrot.slane %v2719_v22, 3  ;;  %v1509_v37 = vrot.slane %v2716_v31, 5  ;;  %v1511_v39 = vrot.slane %v2716_v31, 7 }
 0x45a   :  { %v2733_v48 = vsel %vm118_vm2, %v2642_v29, %v1422_v40  ;;  %v1485_v55 = vrot.slane %v2719_v22, 2  ;;  %v1487_v56 = vrot.slane %v2716_v31, 4  ;;  %v1432_v29 = vrot.slane %v2716_v31, 2 }
 0x45b   :  { %v1521_v50 = vsel %vm118_vm2, %v1507_v36, %v1509_v37  ;;  %v1513_v51 = vsel %vm122_vm3, %v1511_v39, %v1512_v46  ;;  %v1517_v53 = vsel %vm114_vm0, %v1515_v34, %v1516_v30  ;;  %v1474_v57 = vrot.slane %v2710_v8, 4 }
 0x45c   :  { %1655 = vrot.lane.b32.xlu0 %v1464_v19, %s2142_s22  ;;  %v1522_v35 = vsel %vm118_vm2, %v1513_v51, %v1517_v53  ;;  %v1545_v58 = vrot.slane %v2710_v8, 5  ;;  %v1495_v41 = vsel %vm118_vm2, %v1485_v55, %v1487_v56  ;;  %v1549_v60 = vrot.slane %v2413_v18, 7 }
 0x45d   :  { %v1479_v61 = vsel %vm118_vm2, %v1432_v29, %v1474_v57  ;;  %v1489_v38 = vrot.slane %v2716_v31, 6  ;;  %v1527_v63 = vrot.slane %v2719_v22, 4  ;;  %v1525_v1 = vrot.slane %v2662_v52, 4 }
 0x45e   :  { %v1547_v62 = vsel %vm116_vm1, %v1545_v58, %v1546_v59  ;;  %v1452_v4 = vrot.slane %v2719_v22, 5  ;;  %v1455_v5 = vrot.slane %v2719_v22, 7  ;;  %v1539_v54 = vrot.slane %v2413_v18, 6 }
 0x45f   :  { %1625 = vrot.lane.b32.xlu2 %v1533_v33, %s2145_s25  ;;  %v1552_v25 = vsel %vm118_vm2, %v1547_v62, %v1549_v60  ;;  %v1535_v44 = vsel %vm118_vm2, %v1527_v63, %v1489_v38  ;;  %v1534_v6 = vsel %vm118_vm2, %v1525_v1, %v2528_v23  ;;  %v1459_v45 = vrot.slane %v2716_v31, 3  ;;  %v1714_v1 = vld [vmem:[%s2950_s9 + $0x8] sm:$0xff] }
 0x460   :  { %1669 = vrot.lane.b32.xlu1 %v1477_v14, %s2147_s27  ;;  %v1453_v7 = vsel %vm116_vm1, %v2413_v18, %v1452_v4  ;;  %v1460_v15 = vrot.slane %v2710_v8, 3  ;;  %v1542_v3 = vsel %vm118_vm2, %v1474_v57, %v1539_v54  ;;  %v1430_v17 = vrot.slane %v2719_v22, 6  ;;  %v1713_v4 = vld [vmem:[%s2950_s9] sm:$0xff] }
 0x461   :  { %v1465_v11 = vsel %vm118_vm2, %v1453_v7, %v1455_v5  ;;  %v1457_v43 = vrot.slane %v2716_v31, 1  ;;  %v1433_v28 = vrot.slane %v2710_v8, 2  ;;  %v1555_v13 = vsel %vm118_vm2, %v2280_v47, %v2531_v26 }
 0x462   :  { %v1461_v21 = vsel %vm120_vm4, %v1459_v45, %v1460_v15  ;;  %v1490_v46 = vrot.slane %v2710_v8, 6  ;;  %v1494_v40 = vsel %vm118_vm2, %v1483_v0, %v2531_v26  ;;  %v1541_v51 = vsel %vm118_vm2, 0.0, %v2280_v47  ;;  %v1716_v47 = vld [vmem:[%s2950_s9 + $0x18] sm:$0xff] }
 0x463   :  { %v1466_v42 = vsel %vm118_vm2, %v1457_v43, %v1461_v21  ;;  %v1434_v33 = vsel %vm130_vm6, %v1432_v29, %v1433_v28  ;;  %v1551_v0 = vsel %vm118_vm2, %v2255_v32, %v2568_v24  ;;  %v2840_v55 = vand.u32 4294901760, %v1716_v47  ;;  %v1715_v32 = vld [vmem:[%s2950_s9 + $0x10] sm:$0xff] }
 0x464   :  { %1579 = vrot.lane.b32.xlu0 %v1477_v14, %s2143_s23  ;;  %v2798_v14 = vsel %vm118_vm2, %v2716_v31, %v1434_v33  ;;  %v1491_v30 = vsel %vm124_vm5, %v1489_v38, %v1490_v46  ;;  %v1553_v31 = vsel %vm124_vm5, %v1490_v46, %v1539_v54  ;;  %v2846_v29 = vand.u32 4294901760, %v1715_v32 }
 0x465   :  { %v1496_v37 = vsel %vm118_vm2, %v1491_v30, %v2710_v8  ;;  %v1556_v39 = vsel %vm118_vm2, %v1553_v31, %v2413_v18  ;;  %v1809_v24 = vsub.f32 %v1716_v47, %v2840_v55  ;;  %v1756_v7 = vand.u32 4294901760, %v1713_v4 }
 0x466   :  { %v1815_v59 = vsub.f32 %v1715_v32, %v2846_v29 }
 0x467   :  { %1563 = vrot.lane.b32.xlu2 %v1464_v19, %s2140_s0  ;;  %v1471_v19 = vsel %vm124_vm5, %v2528_v23, %v1430_v17  ;;  %v1530_v23 = vrot.slane %v2413_v18, 2  ;;  %v1810_v58 = vand.u32 4294901760, %v1809_v24 }
 0x468   :  { %1613 = vrot.lane.b32.xlu1 %v1521_v50, %s2144_s24  ;;  %v1478_v27 = vsel %vm118_vm2, %v1471_v19, %v2719_v22  ;;  %v1505_v50 = vrot.slane %v2662_v52, 3  ;;  %v1717_v52 = vld [vmem:[%s2950_s9 + $0x20] sm:$0xf] }
 0x469   :  { %v1531_v34 = vsel %vm130_vm6, %v1433_v28, %v1530_v23  ;;  %v1811_v60 = vsub.f32 %v1809_v24, %v1810_v58 }
 0x46a   :  { %v1536_v36 = vsel %vm118_vm2, %v2710_v8, %v1531_v34  ;;  %v1520_v8 = vsel %vm118_vm2, %v1505_v50, %v2413_v18  ;;  %v1735_v18 = vsel %vm118_vm2, %v1717_v52, 0 }
 0x46c   :  { %1615 = vrot.lane.b32.xlu0 %v1522_v35, %s2144_s24  ;;  %v1748_v35 = vand.u32 4294901760, %v1735_v18 }
 0x46e   :  { %v1803_v57 = vsub.f32 %v1735_v18, %v1748_v35  ;;  %1749 = vmatpush.msra.mxu0 %v1748_v35  ;;  %2113 = vmatpush.msra.mxu2 %v1748_v35 }
 0x46f   :  { %1597 = vrot.lane.b32.xlu2 %v1495_v41, %s2141_s21 }
 0x470   :  { %1673 = vrot.lane.b32.xlu1 %v1479_v61, %s2147_s27  ;;  %v1804_v41 = vand.u32 4294901760, %v1803_v57  ;;  %1751 = vmatpush.msra.mxu0 %v2840_v55 }
 0x471   :  { %2114 = vmatpush.msra.mxu2 %v2840_v55 }
 0x472   :  { %v1805_v62 = vsub.f32 %v1803_v57, %v1804_v41  ;;  %1753 = vmatpush.msra.mxu0 %v2846_v29 }
 0x473   :  { %2115 = vmatpush.msra.mxu2 %v2846_v29 }
 0x474   :  { %1661 = vrot.lane.b32.xlu0 %v1552_v25, %s2142_s22  ;;  %v1806_v25 = vand.u32 4294901760, %v1805_v62 }
 0x476   :  { %1807 = vmatpush.msra.mxu1 %v1806_v25  ;;  %2118 = vmatpush.msra.mxu3 %v1806_v25 }
 0x477   :  { %1629 = vrot.lane.b32.xlu2 %v1535_v44, %s2145_s25  ;;  %v1812_v44 = vand.u32 4294901760, %v1811_v60 }
 0x478   :  { %1583 = vrot.lane.b32.xlu1 %v1479_v61, %s2143_s23  ;;  %v1816_v61 = vand.u32 4294901760, %v1815_v59 }
 0x479   :  { %1813 = vmatpush.msra.mxu1 %v1812_v44  ;;  %2119 = vmatpush.msra.mxu3 %v1812_v44 }
 0x47a   :  { %v1817_v38 = vsub.f32 %v1815_v59, %v1816_v61 }
 0x47c   :  { %1627 = vrot.lane.b32.xlu0 %v1534_v6, %s2145_s25  ;;  %v1818_v5 = vand.u32 4294901760, %v1817_v38  ;;  %v1754_v6 = vand.u32 4294901760, %v1714_v1 }
 0x47e   :  { %v1821_v54 = vsub.f32 %v1714_v1, %v1754_v6  ;;  %1755 = vmatpush.msra.mxu0 %v1754_v6  ;;  %2116 = vmatpush.msra.mxu2 %v1754_v6 }
 0x47f   :  { %1565 = vrot.lane.b32.xlu2 %v1465_v11, %s2140_s0  ;;  %v1827_v11 = vsub.f32 %v1713_v4, %v1756_v7  ;;  %1819 = vmatpush.msra.mxu1 %v1818_v5 }
 0x480   :  { %1647 = vrot.lane.b32.xlu1 %v1542_v3, %s2146_s26  ;;  %v1822_v45 = vand.u32 4294901760, %v1821_v54  ;;  %1757 = vmatpush.msra.mxu0 %v1756_v7 }
 0x481   :  { %v1828_v15 = vand.u32 4294901760, %v1827_v11  ;;  %2120 = vmatpush.msra.mxu3 %v1818_v5  ;;  %2117 = vmatpush.msra.mxu2 %v1756_v7 }
 0x482   :  { %v1823_v3 = vsub.f32 %v1821_v54, %v1822_v45  ;;  %1956 = vmatpush.msrb.mxu0 %v1804_v41 }
 0x483   :  { %v1829_v43 = vsub.f32 %v1827_v11, %v1828_v15  ;;  %1862 = vmatpush.msrb.mxu2 %v1803_v57 }
 0x484   :  { %1671 = vrot.lane.b32.xlu0 %v1555_v13, %s2147_s27  ;;  %1960 = vmatpush.msrb.mxu0 %v1810_v58  ;;  %v1438_v58 = vsel %vm118_vm2, %v2531_v26, %v1430_v17 }
 0x485   :  { %1865 = vmatpush.msrb.mxu2 %v1809_v24 }
 0x486   :  { %1964 = vmatpush.msrb.mxu0 %v1816_v61 }
 0x487   :  { %1659 = vrot.lane.b32.xlu2 %v1466_v42, %s2142_s22  ;;  %1868 = vmatpush.msrb.mxu2 %v1815_v59 }
 0x488   :  { %1581 = vrot.lane.b32.xlu1 %v1478_v27, %s2143_s23  ;;  %v1830_v27 = vand.u32 4294901760, %v1829_v43  ;;  %1968 = vmatpush.msrb.mxu0 %v1822_v45 }
 0x489   :  { %1871 = vmatpush.msrb.mxu2 %v1821_v54 }
 0x48a   :  { %1972 = vmatpush.msrb.mxu0 %v1828_v15 }
 0x48b   :  { %1874 = vmatpush.msrb.mxu2 %v1827_v11 }
 0x48f   :  { %1567 = vrot.lane.b32.xlu2 %v1466_v42, %s2140_s0  ;;  %v1824_v42 = vand.u32 4294901760, %v1823_v3 }
 0x490   :  { %1645 = vrot.lane.b32.xlu1 %v2798_v14, %s2146_s26 }
 0x491   :  { %1825 = vmatpush.msra.mxu1 %v1824_v42  ;;  %2121 = vmatpush.msra.mxu3 %v1824_v42 }
 0x493   :  { %1831 = vmatpush.msra.mxu1 %v1830_v27  ;;  %2122 = vmatpush.msra.mxu3 %v1830_v27 }
 0x495   :  { %1908 = vmatpush.msrb.mxu3 %v1748_v35  ;;  %2002 = vmatpush.msrb.mxu1 %v1748_v35 }
 0x497   :  { %1631 = vrot.lane.b32.xlu2 %v1536_v36, %s2145_s25  ;;  %1910 = vmatpush.msrb.mxu3 %v2840_v55 }
 0x498   :  { %1599 = vrot.lane.b32.xlu1 %v1496_v37, %s2141_s21  ;;  %2004 = vmatpush.msrb.mxu1 %v2840_v55 }
 0x499   :  { %1912 = vmatpush.msrb.mxu3 %v2846_v29 }
 0x49a   :  { %2006 = vmatpush.msrb.mxu1 %v2846_v29 }
 0x49b   :  { %1914 = vmatpush.msrb.mxu3 %v1754_v6 }
 0x49c   :  { %2008 = vmatpush.msrb.mxu1 %v1754_v6 }
 0x49d   :  { %1916 = vmatpush.msrb.mxu3 %v1756_v7 }
 0x49e   :  { %2010 = vmatpush.msrb.mxu1 %v1756_v7 }
 0x49f   :  { %1675 = vrot.lane.b32.xlu2 %v1556_v39, %s2147_s27 }
 0x4a0   :  { %1595 = vrot.lane.b32.xlu1 %v1494_v40, %s2141_s21 }
 0x4a7   :  { %1611 = vrot.lane.b32.xlu2 %v1520_v8, %s2144_s24 }
 0x4a8   :  { %1643 = vrot.lane.b32.xlu1 %v1541_v51, %s2146_s26 }
 0x4a9   :  { %v2827_v53 = vpop.permute.xlu2 %1577 }
 0x4af   :  { %1657 = vrot.lane.b32.xlu2 %v1551_v0, %s2142_s22 }
 0x4b1   :  { %v1562_v56 = vpop.permute.xlu2 %1561 }
 0x4b2   :  { %v1681_v13 = vsel %vm342_vm7, %v2733_v48, %v1562_v56 }
 0x4b3   :  { %v1685_v23 = vsel %vm344_vm8, %v1681_v13, %v2827_v53 }
 0x4b9   :  { %v1626_v63 = vpop.permute.xlu2 %1625 }
 0x4c1   :  { %v2859_v21 = vpop.permute.xlu2 %1563 }
 0x4c2   :  { %v1594_v19 = vpop.permute.xlu1 %1593 }
 0x4c3   :  { %v1689_v34 = vsel %vm346_vm9, %v1685_v23, %v1594_v19 }
 0x4c6   :  { %v1610_v28 = vpop.permute.xlu0 %1609 }
 0x4c7   :  { %v1693_v48 = vsel %vm348_vm10, %v1689_v34, %v1610_v28 }
 0x4c8   :  { %v1697_v36 = vsel %vm350_vm11, %v1693_v48, %v1626_v63 }
 0x4c9   :  { %v1598_v46 = vpop.permute.xlu2 %1597 }
 0x4ca   :  { %v1642_v33 = vpop.permute.xlu1 %1641 }
 0x4cb   :  { %v1701_v37 = vsel %vm352_vm12, %v1697_v36, %v1642_v33 }
 0x4ce   :  { %v1656_v30 = vpop.permute.xlu0 %1655 }
 0x4cf   :  { %v1705_v31 = vsel %vm354_vm13, %v1701_v37, %v1656_v30 }
 0x4d1   :  { %v1630_v8 = vpop.permute.xlu2 %1629 }
 0x4d2   :  { %v1670_v39 = vpop.permute.xlu1 %1669 }
 0x4d3   :  { %v1709_v40 = vsel %vm356_vm14, %v1705_v31, %v1670_v39 }
 0x4d4   :  { %v1723_v50 = vsel %vm367_vm15, %v1709_v40, 0 }
 0x4d5   :  { %v2876_v51 = vand.u32 4294901760, %v1723_v50 }
 0x4d6   :  { %v1580_v57 = vpop.permute.xlu0 %1579 }
 0x4d7   :  { %v2879_v53 = vsub.f32 %v1723_v50, %v2876_v51  ;;  %1833 = vmatmul.f32.vlgmr.msra.gmra.mxu1 %v2876_v51 }
 0x4d9   :  { %v1760_v0 = vand.u32 4294901760, %v2879_v53  ;;  %v1566_v55 = vpop.permute.xlu2 %1565 }
 0x4da   :  { %v1614_v52 = vpop.permute.xlu1 %1613  ;;  %v1683_v59 = vsel %vm342_vm7, %v1438_v58, %v1566_v55 }
 0x4db   :  { %v1761_v47 = vsub.f32 %v2879_v53, %v1760_v0 }
 0x4dd   :  { %v1762_v18 = vand.u32 4294901760, %v1761_v47 }
 0x4de   :  { %v1616_v38 = vpop.permute.xlu0 %1615 }
 0x4df   :  { %1763 = vmatmul.f32.vlgmr.msra.gmra.mxu0 %v1762_v18 }
 0x4e1   :  { %v1660_v35 = vpop.permute.xlu2 %1659 }
 0x4e2   :  { %v1674_v56 = vpop.permute.xlu1 %1673 }
 0x4e6   :  { %v1662_v7 = vpop.permute.xlu0 %1661 }
 0x4e9   :  { %v1568_v29 = vpop.permute.xlu2 %1567 }
 0x4ea   :  { %v1584_v32 = vpop.permute.xlu1 %1583  ;;  %v1684_v4 = vsel %vm342_vm7, %v2798_v14, %v1568_v29 }
 0x4eb   :  { %v1688_v11 = vsel %vm344_vm8, %v1684_v4, %v1584_v32 }
 0x4ee   :  { %v1628_v34 = vpop.permute.xlu0 %1627 }
 0x4f1   :  { %v1632_v62 = vpop.permute.xlu2 %1631 }
 0x4f2   :  { %v1648_v24 = vpop.permute.xlu1 %1647 }
 0x4f6   :  { %v1672_v18 = vpop.permute.xlu0 %1671 }
 0x4f9   :  { %v1676_v5 = vpop.permute.xlu2 %1675 }
 0x4fa   :  { %v1582_v41 = vpop.permute.xlu1 %1581 }
 0x4fb   :  { %v1687_v60 = vsel %vm344_vm8, %v1683_v59, %v1582_v41 }
 0x4fc   :  { %v1691_v61 = vsel %vm346_vm9, %v1687_v60, %v1598_v46  ;;  %v1682_v46 = vsel %vm342_vm7, %v2691_v16, %v2859_v21 }
 0x4fd   :  { %v1695_v63 = vsel %vm348_vm10, %v1691_v61, %v1614_v52  ;;  %v1686_v36 = vsel %vm344_vm8, %v1682_v46, %v1580_v57  ;;  %v2136_v61 = vld [vmem:[%s2951_s10] ss:$0 sm:$0xff] }
 0x4fe   :  { %v1699_v44 = vsel %vm350_vm11, %v1695_v63, %v1630_v8 }
 0x501   :  { %v1612_v33 = vpop.permute.xlu2 %1611 }
 0x502   :  { %v1646_v25 = vpop.permute.xlu1 %1645 }
 0x503   :  { %v1703_v1 = vsel %vm352_vm12, %v1699_v44, %v1646_v25 }
 0x504   :  { %v1707_v22 = vsel %vm354_vm13, %v1703_v1, %v1660_v35 }
 0x505   :  { %v1711_v26 = vsel %vm356_vm14, %v1707_v22, %v1674_v56 }
 0x506   :  { %v1729_v17 = vsel %vm367_vm15, %v1711_v26, 0 }
 0x507   :  { %v1774_v6 = vand.u32 4294901760, %v1729_v17 }
 0x509   :  { %1841 = vmatmul.f32.vlgmr.msra.gmra.mxu3 %v1774_v6  ;;  %v1775_v54 = vsub.f32 %v1729_v17, %v1774_v6  ;;  %v1658_v8 = vpop.permute.xlu2 %1657 }
 0x50a   :  { %v1600_v45 = vpop.permute.xlu1 %1599 }
 0x50b   :  { %v1692_v15 = vsel %vm346_vm9, %v1688_v11, %v1600_v45  ;;  %v1776_v3 = vand.u32 4294901760, %v1775_v54 }
 0x50c   :  { %v1696_v43 = vsel %vm348_vm10, %v1692_v15, %v1616_v38 }
 0x50d   :  { %v1700_v19 = vsel %vm350_vm11, %v1696_v43, %v1632_v62  ;;  %v1777_v42 = vsub.f32 %v1775_v54, %v1776_v3 }
 0x50e   :  { %v1704_v27 = vsel %vm352_vm12, %v1700_v19, %v1648_v24 }
 0x50f   :  { %v1708_v14 = vsel %vm354_vm13, %v1704_v27, %v1662_v7  ;;  %v1778_v28 = vand.u32 4294901760, %v1777_v42 }
 0x510   :  { %v1712_v13 = vsel %vm356_vm14, %v1708_v14, %v1676_v5 }
 0x511   :  { %1779 = vmatmul.f32.vlgmr.msra.gmra.mxu2 %v1778_v28  ;;  %v1732_v23 = vsel %vm367_vm15, %v1712_v13, 0 }
 0x512   :  { %v1596_v48 = vpop.permute.xlu1 %1595  ;;  %v1782_v30 = vand.u32 4294901760, %v1732_v23 }
 0x513   :  { %v1690_v37 = vsel %vm346_vm9, %v1686_v36, %v1596_v48 }
 0x514   :  { %1845 = vmatmul.f32.gmra.mxu3 %v1782_v30  ;;  %v1783_v31 = vsub.f32 %v1732_v23, %v1782_v30  ;;  %v1694_v40 = vsel %vm348_vm10, %v1690_v37, %v1612_v33 }
 0x515   :  { %v1698_v47 = vsel %vm350_vm11, %v1694_v40, %v1628_v34 }
 0x516   :  { %v1784_v39 = vand.u32 4294901760, %v1783_v31 }
 0x518   :  { %v1785_v50 = vsub.f32 %v1783_v31, %v1784_v39 }
 0x51a   :  { %v1644_v52 = vpop.permute.xlu1 %1643  ;;  %v1786_v55 = vand.u32 4294901760, %v1785_v50 }
 0x51b   :  { %v1702_v16 = vsel %vm352_vm12, %v1698_v47, %v1644_v52 }
 0x51c   :  { %v1706_v21 = vsel %vm354_vm13, %v1702_v16, %v1658_v8  ;;  %1787 = vmatmul.f32.gmra.mxu2 %v1786_v55  ;;  %1920 = vmatmul.f32.vlgmr.msrb.gmra.mxu3 %v1760_v0 }
 0x51d   :  { %v1710_v56 = vsel %vm356_vm14, %v1706_v21, %v1672_v18 }
 0x51e   :  { %v1726_v35 = vsel %vm367_vm15, %v1710_v56, 0 }
 0x51f   :  { %v1766_v32 = vand.u32 4294901760, %v1726_v35 }
 0x521   :  { %v1767_v24 = vsub.f32 %v1726_v35, %v1766_v32  ;;  %1837 = vmatmul.f32.gmra.mxu1 %v1766_v32 }
 0x523   :  { %v1768_v29 = vand.u32 4294901760, %v1767_v24 }
 0x524   :  { %1877 = vmatmul.f32.vlgmr.msrb.gmra.mxu2 %v2879_v53 }
 0x525   :  { %1926 = vmatmul.f32.gmra.mxu3 %v1768_v29  ;;  %v1769_v57 = vsub.f32 %v1767_v24, %v1768_v29 }
 0x527   :  { %v1770_v58 = vand.u32 4294901760, %v1769_v57 }
 0x529   :  { %1771 = vmatmul.f32.gmra.mxu0 %v1770_v58  ;;  %2012 = vmatmul.f32.vlgmr.msrb.gmra.mxu1 %v2876_v51 }
 0x52c   :  { %1882 = vmatmul.f32.gmra.mxu2 %v1767_v24 }
 0x52d   :  { %1932 = vmatmul.f32.gmra.mxu3 %v1776_v3 }
 0x531   :  { %1974 = vmatmul.f32.vlgmr.msrb.gmra.mxu0 %v2876_v51  ;;  %2016 = vmatmul.f32.gmra.mxu1 %v1766_v32 }
 0x534   :  { %1887 = vmatmul.f32.gmra.mxu2 %v1775_v54 }
 0x535   :  { %1938 = vmatmul.f32.gmra.mxu3 %v1784_v39 }
 0x539   :  { %1978 = vmatmul.f32.gmra.mxu0 %v1766_v32  ;;  %2020 = vmatmul.f32.gmra.mxu1 %v1774_v6 }
 0x53c   :  { %1892 = vmatmul.f32.gmra.mxu2 %v1783_v31 }
 0x541   :  { %1982 = vmatmul.f32.gmra.mxu0 %v1774_v6  ;;  %2024 = vmatmul.f32.gmra.mxu1 %v1782_v30 }
 0x549   :  { %1986 = vmatmul.f32.gmra.mxu0 %v1782_v30 }
 0x554   :  { %v1834_v59 = vpop.f32.mrf.mxu1 }
 0x55c   :  { %v1764_v60 = vpop.f32.mrf.mxu0 }
 0x55d   :  { %v1765_v38 = vadd.f32 %v2136_v61, %v1764_v60 }
 0x55f   :  { %v1835_v44 = vadd.f32 %v1834_v59, %v1765_v38 }
 0x58c   :  { %v1842_v53 = vpop.f32.mrf.mxu3 }
 0x594   :  { %v1780_v0 = vpop.f32.mrf.mxu2 }
 0x595   :  { %v1781_v3 = vadd.f32 %v2136_v61, %v1780_v0 }
 0x597   :  { %v1846_v41 = vpop.f32.mrf.mxu3  ;;  %v1843_v13 = vadd.f32 %v1842_v53, %v1781_v3 }
 0x59e   :  { %v1838_v51 = vpop.f32.mrf.mxu1 }
 0x59f   :  { %v1788_v62 = vpop.f32.mrf.mxu2  ;;  %v1921_v63 = vpop.f32.mrf.mxu3 }
 0x5a0   :  { %v1789_v30 = vadd.f32 %v2136_v61, %v1788_v62 }
 0x5a2   :  { %v1847_v8 = vadd.f32 %v1846_v41, %v1789_v30 }
 0x5a6   :  { %v1772_v25 = vpop.f32.mrf.mxu0  ;;  %v2013_v26 = vpop.f32.mrf.mxu1 }
 0x5a7   :  { %v1878_v1 = vpop.f32.mrf.mxu2  ;;  %v1773_v17 = vadd.f32 %v2136_v61, %v1772_v25 }
 0x5a8   :  { %v1879_v22 = vadd.f32 %v1878_v1, %v1835_v44  ;;  %v1927_v11 = vpop.f32.mrf.mxu3 }
 0x5a9   :  { %v1839_v7 = vadd.f32 %v1838_v51, %v1773_v17 }
 0x5aa   :  { %v1922_v4 = vadd.f32 %v1921_v63, %v1879_v22 }
 0x5ae   :  { %v1975_v5 = vpop.f32.mrf.mxu0  ;;  %v2017_v19 = vpop.f32.mrf.mxu1 }
 0x5af   :  { %v1976_v6 = vadd.f32 %v1975_v5, %v1922_v4  ;;  %v1883_v54 = vpop.f32.mrf.mxu2 }
 0x5b0   :  { %v1884_v15 = vadd.f32 %v1883_v54, %v1839_v7  ;;  %v1933_v48 = vpop.f32.mrf.mxu3 }
 0x5b1   :  { %v2014_v45 = vadd.f32 %v2013_v26, %v1976_v6 }
 0x5b2   :  { %v1928_v42 = vadd.f32 %v1927_v11, %v1884_v15 }
 0x5b3   :  { %v2028_v43 = vmax.f32 %v2014_v45, 0.0 }
 0x5b5   :  { %v2032_v27 = vmul.f32 %v2028_v43, %v2631_v10 }
 0x5b6   :  { %v1979_v14 = vpop.f32.mrf.mxu0  ;;  %v2021_v39 = vpop.f32.mrf.mxu1 }
 0x5b7   :  { %v1980_v28 = vadd.f32 %v1979_v14, %v1928_v42  ;;  %v1888_v33 = vpop.f32.mrf.mxu2  ;;  %v2036_v23 = vadd.f32 %v2032_v27, %v2214_v2 }
 0x5b8   :  { %v1889_v34 = vadd.f32 %v1888_v33, %v1843_v13  ;;  %v1939_v16 = vpop.f32.mrf.mxu3 }
 0x5b9   :  { %v2018_v46 = vadd.f32 %v2017_v19, %v1980_v28  ;;  %2040 = vxpose.xlu1.b32.start [1/2] (short) (narrow) %v2036_v23, 8 }
 0x5ba   :  { %v1934_v31 = vadd.f32 %v1933_v48, %v1889_v34 }
 0x5bb   :  { %v2029_v36 = vmax.f32 %v2018_v46, 0.0 }
 0x5bd   :  { %v2033_v37 = vmul.f32 %v2029_v36, %v2631_v10 }
 0x5be   :  { %v1983_v40 = vpop.f32.mrf.mxu0  ;;  %v2025_v24 = vpop.f32.mrf.mxu1 }
 0x5bf   :  { %v1984_v50 = vadd.f32 %v1983_v40, %v1934_v31  ;;  %v1893_v52 = vpop.f32.mrf.mxu2  ;;  %v2037_v47 = vadd.f32 %v2033_v37, %v2225_v9 }
 0x5c0   :  { %v1894_v55 = vadd.f32 %v1893_v52, %v1847_v8 }
 0x5c1   :  { %v2022_v18 = vadd.f32 %v2021_v39, %v1984_v50  ;;  %2041 = vxpose.xlu1.b32.end [2/2] (short) (narrow) %v2037_v47, 8 }
 0x5c2   :  { %v1940_v21 = vadd.f32 %v1939_v16, %v1894_v55 }
 0x5c3   :  { %v2030_v2 = vmax.f32 %v2022_v18, 0.0 }
 0x5c5   :  { %v2034_v56 = vmul.f32 %v2030_v2, %v2633_v12 }
 0x5c6   :  { %v1987_v35 = vpop.f32.mrf.mxu0 }
 0x5c7   :  { %v1988_v32 = vadd.f32 %v1987_v35, %v1940_v21  ;;  %v2038_v10 = vadd.f32 %v2034_v56, %v2239_v20 }
 0x5c9   :  { %v2026_v29 = vadd.f32 %v2025_v24, %v1988_v32  ;;  %2072 = vxpose.xlu2.b32.start [1/2] (short) (narrow) %v2038_v10, 8 }
 0x5cb   :  { %v2031_v57 = vmax.f32 %v2026_v29, 0.0 }
 0x5cd   :  { %v2035_v58 = vmul.f32 %v2031_v57, %v2633_v12 }
 0x5cf   :  { %v2039_v9 = vadd.f32 %v2035_v58, %v2283_v49 }
 0x5d1   :  { %2073 = vxpose.xlu2.b32.end [2/2] (short) (narrow) %v2039_v9, 8 }
 0x65d   :  { %v2056_v0 = vpop.trf.xlu1 }
 0x662   :  { %v2088_v53 = vpop.trf.xlu2 }
 0x663   :  { %v2105_v59 = vrot.slane %v2088_v53, 4 }
 0x665   :  { %v2107_v41 = vsel %vm118_vm2, %v2056_v0, %v2105_v59 }
 0x666   :  { %2108 = vst.msk [vmem:[%s2952_s11] sm:$0xff] %vm348_vm10, %v2107_v41 }

</bundles_post_ra>
